<compile_context>
chip_gen: v5e
topology: v5e:2x2
jax: 0.10.0
libtpu: 0.0.40
codegen_flags: <defaults>
</compile_context>

<pallas_src>
import functools
import math

import jax
import jax.numpy as jnp
from jax import lax
from jax.experimental import pallas as pl
from jax.experimental.pallas import tpu as pltpu


def _round_up(x, m):
    return (x + m - 1) // m * m


def _conv2d_kernel(x_ref, w_ref, b_ref, o_ref, *, KH, KW, sh, dh, dw, HB, WT):
    """One grid step = (batch n, block of HB output rows).

    x_ref: (1, H_in_pad, C_in_pad, W_in_pad)  full padded image of batch n
    w_ref: (C_out_pad, KH*KW*C_in_pad)        pre-flattened weight, row order (kh,kw,ci)
    b_ref: (C_out_pad, 1)                     f32 bias
    o_ref: (1, HB, C_out_pad, WT)             WT is a multiple of 128 (lane-dense store)
    """
    hb = pl.program_id(1)
    w_flat = w_ref[...]
    bias = b_ref[...]

    # HB is small and static -> unrolled; each row's accumulator is stored
    # immediately so the live f32 accumulator is only (C_out_pad, WT).
    for r in range(HB):
        h = hb * HB + r                       # output row (stride applied below)
        pieces = []
        for kh in range(KH):
            row = x_ref[0, h * sh + kh * dh]  # (C_in_pad, W_in_pad)
            for kw in range(KW):
                pieces.append(row[:, kw * dw: kw * dw + WT])  # static lane slice
        slab = jnp.concatenate(pieces, axis=0)                # (KH*KW*C_in_pad, WT)
        acc = jnp.dot(w_flat, slab, preferred_element_type=jnp.float32)
        acc = acc + bias                                      # (C_out_pad, 1) broadcast
        o_ref[0, r] = acc.astype(o_ref.dtype)


def conv2d_same_padding(x, weight, bias=None, *, stride=(1, 1), dilation=(1, 1),
                        groups=1, compute_dtype=None, hb_rows=8):
    """Matches the torch conv2d_same_padding semantics for groups=1 (NCHW / OIHW)."""
    if groups != 1:
        # TODO(synk): grouped conv not implemented (module default groups=1).
        raise NotImplementedError("groups != 1 not supported")

    def _pair(v):
        return (v, v) if isinstance(v, int) else tuple(v)

    sh, sw = _pair(stride)
    dh, dw = _pair(dilation)
    N, C_in, H, W = x.shape
    C_out, C_in_w, KH, KW = weight.shape
    assert C_in_w == C_in

    # --- SAME padding exactly as the PyTorch reference (extra odd pad bottom/right)
    out_rows = (H + sh - 1) // sh
    pad_rows = max(0, (out_rows - 1) * sh + (KH - 1) * dh + 1 - H)
    out_cols = (W + sw - 1) // sw
    pad_cols = max(0, (out_cols - 1) * sw + (KW - 1) * dw + 1 - W)
    pad_top, pad_bottom = pad_rows // 2, pad_rows - pad_rows // 2
    pad_left, pad_right = pad_cols // 2, pad_cols - pad_cols // 2

    H_out = (H + pad_rows - dh * (KH - 1) - 1) // sh + 1
    W_out = (W + pad_cols - dw * (KW - 1) - 1) // sw + 1

    cdt = compute_dtype if compute_dtype is not None else x.dtype
    out_dtype = x.dtype
    itemsize = jnp.dtype(cdt).itemsize
    sub_pack = max(8, 32 // itemsize)           # sublane packing: 8 (f32) / 16 (bf16)

    # --- kernel-side geometry ---
    # Kernel computes output columns at stride 1; the wrapper subsamples ::sw.
    W_cols = (W_out - 1) * sw + 1
    WT = _round_up(W_cols, 128)                 # lane-dense output width

    HB = max(1, min(H_out, hb_rows))            # output rows per grid step
    num_hb = -(-H_out // HB)
    H_out_pad = num_hb * HB

    C_in_pad = _round_up(C_in, sub_pack)
    C_out_pad = _round_up(C_out, 8)
    KC = KH * KW * C_in_pad

    # Input rows/cols the kernel may touch (extra rows/cols are zeros; outputs
    # computed from them are sliced off afterwards).
    H_in_need = (H_out_pad - 1) * sh + (KH - 1) * dh + 1
    W_in_need = (WT - 1) + (KW - 1) * dw + 1
    pad_bottom_k = max(pad_bottom, H_in_need - H - pad_top)
    W_in_pad = _round_up(max(W + pad_left + pad_right, W_in_need), 128)
    pad_right_k = W_in_pad - W - pad_left
    H_in_pad = H + pad_top + pad_bottom_k

    # (N, C, H, W) -> (N, H, C, W), zero-pad channels / spatial, cast to compute dtype.
    x_t = jnp.transpose(x, (0, 2, 1, 3)).astype(cdt)
    x_t = jnp.pad(x_t, ((0, 0), (pad_top, pad_bottom_k),
                        (0, C_in_pad - C_in), (pad_left, pad_right_k)))

    # Weight (C_out, C_in, KH, KW) -> (C_out_pad, KH*KW*C_in_pad), row order (kh, kw, ci).
    w_p = jnp.pad(weight, ((0, C_out_pad - C_out), (0, C_in_pad - C_in), (0, 0), (0, 0)))
    w_flat = jnp.transpose(w_p, (0, 2, 3, 1)).reshape(C_out_pad, KC).astype(cdt)

    if bias is None:
        b2d = jnp.zeros((C_out_pad, 1), jnp.float32)
    else:
        b2d = jnp.pad(bias.astype(jnp.float32), (0, C_out_pad - C_out)).reshape(C_out_pad, 1)

    kernel = functools.partial(_conv2d_kernel, KH=KH, KW=KW, sh=sh, dh=dh, dw=dw,
                               HB=HB, WT=WT)

    # VMEM budget: double-buffered input / output blocks + weights, with headroom.
    x_blk = H_in_pad * C_in_pad * W_in_pad * itemsize
    o_blk = HB * C_out_pad * WT * jnp.dtype(out_dtype).itemsize
    w_bytes = w_flat.size * itemsize + b2d.size * 4
    vmem_need = 2 * (x_blk + o_blk + w_bytes) + (1 << 20)
    vmem_limit = int(min(max(vmem_need, 32 * 1024 * 1024), 100 * 1024 * 1024))

    cost = pl.CostEstimate(
        flops=int(2.0 * N * H_out_pad * WT * C_out_pad * KC),
        transcendentals=0,
        bytes_accessed=int(x_t.size * itemsize + w_flat.size * itemsize
                           + N * H_out_pad * C_out_pad * WT
                           * jnp.dtype(out_dtype).itemsize))

    out = pl.pallas_call(
        kernel,
        out_shape=jax.ShapeDtypeStruct((N, H_out_pad, C_out_pad, WT), out_dtype),
        grid_spec=pltpu.PrefetchScalarGridSpec(
            num_scalar_prefetch=0,
            grid=(N, num_hb),
            in_specs=[
                pl.BlockSpec((1, H_in_pad, C_in_pad, W_in_pad),
                             lambda n, hb: (n, 0, 0, 0)),
                pl.BlockSpec((C_out_pad, KC), lambda n, hb: (0, 0)),
                pl.BlockSpec((C_out_pad, 1), lambda n, hb: (0, 0)),
            ],
            out_specs=pl.BlockSpec((1, HB, C_out_pad, WT),
                                   lambda n, hb: (n, hb, 0, 0)),
        ),
        compiler_params=pltpu.CompilerParams(
            dimension_semantics=("parallel", "parallel"),
            vmem_limit_bytes=vmem_limit),
        cost_estimate=cost,
    )(x_t, w_flat, b2d)

    # (N, H_out_pad, C_out_pad, WT) -> (N, C_out, H_out, W_out)
    out = out[:, :H_out, :C_out, :W_cols]
    if sw > 1:
        out = out[..., ::sw]
    return jnp.transpose(out, (0, 2, 1, 3))


class Conv2dSamePadding:
    """JAX/Pallas port of Conv2d_samepadding (deterministic init, forward only)."""

    def __init__(self, in_channels, out_channels, kernel_size, stride=1,
                 padding=0, dilation=1, groups=1, bias=True, key=None,
                 compute_dtype=None):
        def _pair(v):
            return (v, v) if isinstance(v, int) else tuple(v)
        self.kernel_size = _pair(kernel_size)
        self.stride = _pair(stride)
        self.dilation = _pair(dilation)
        self.groups = groups
        self.compute_dtype = compute_dtype
        n = in_channels
        for k in self.kernel_size:
            n *= k
        stdv = 1.0 / math.sqrt(n)
        if key is None:
            key = jax.random.PRNGKey(0)
        kw_, kb_ = jax.random.split(key)
        self.weight = jax.random.uniform(
            kw_, (out_channels, in_channels // groups, *self.kernel_size),
            minval=-stdv, maxval=stdv, dtype=jnp.float32)
        self.bias = (jax.random.uniform(kb_, (out_channels,), minval=-stdv,
                                        maxval=stdv, dtype=jnp.float32)
                     if bias else None)

    def __call__(self, x):
        return conv2d_same_padding(
            x, self.weight, self.bias, stride=self.stride,
            dilation=self.dilation, groups=self.groups,
            compute_dtype=self.compute_dtype)


def _reference_conv(x, w, b, stride, dilation):
    """Pure-JAX reference reproducing the torch conv2d_same_padding."""
    sh, sw = stride
    dh, dw = dilation
    N, C_in, H, W = x.shape
    C_out, _, KH, KW = w.shape
    out_rows = (H + sh - 1) // sh
    pad_rows = max(0, (out_rows - 1) * sh + (KH - 1) * dh + 1 - H)
    out_cols = (W + sw - 1) // sw
    pad_cols = max(0, (out_cols - 1) * sw + (KW - 1) * dw + 1 - W)
    pad = [(pad_rows // 2, pad_rows - pad_rows // 2),
           (pad_cols // 2, pad_cols - pad_cols // 2)]
    out = lax.conv_general_dilated(
        x, w, window_strides=(sh, sw), padding=pad, rhs_dilation=(dh, dw),
        dimension_numbers=("NCHW", "OIHW", "NCHW"))
    if b is not None:
        out = out + b.reshape(1, C_out, 1, 1)
    return out


if __name__ == "__main__":
    key = jax.random.PRNGKey(0)
    kx, kp = jax.random.split(key)

    # Small NCHW shapes consistent with the 2-D conv module.
    N, C_in, C_out, H, W, K = 2, 4, 8, 16, 16, 3
    x = jax.random.normal(kx, (N, C_in, H, W), dtype=jnp.float32)

    conv = Conv2dSamePadding(C_in, C_out, K, stride=1, dilation=1, key=kp)

    out = jax.block_until_ready(conv(x))
    ref = _reference_conv(x, conv.weight, conv.bias, conv.stride, conv.dilation)
    assert out.shape == ref.shape == (N, C_out, H, W)
    assert jnp.allclose(out, ref, atol=1e-4, rtol=1e-4)

    # bf16 fast path (f32 MXU accumulation) -- looser tolerance.
    out_bf16 = jax.block_until_ready(
        conv2d_same_padding(x, conv.weight, conv.bias, stride=conv.stride,
                            dilation=conv.dilation,
                            compute_dtype=jnp.bfloat16))
    assert out_bf16.shape == ref.shape
    assert jnp.allclose(out_bf16, ref, atol=5e-2, rtol=5e-2)

    print("KERNEL_OK")
</pallas_src>

<mosaic_0001>
module attributes {stable_mosaic.version = 11 : i64} {
  func.func @_conv2d_kernel(%arg0: i32, %arg1: i32, %arg2: memref<1x18x8x256xf32, #tpu.memory_space<vmem>>, %arg3: memref<8x72xf32, #tpu.memory_space<vmem>>, %arg4: memref<8x1xf32, #tpu.memory_space<vmem>>, %arg5: memref<1x8x8x128xf32, #tpu.memory_space<vmem>>) attributes {dimension_semantics = [#tpu.dimension_semantics<parallel>, #tpu.dimension_semantics<parallel>], iteration_bounds = array<i64: 2, 2>, scalar_prefetch = 0 : i64, scratch_operands = 0 : i64, tpu.core_type = #tpu.core_type<tc>, window_params = [{transform_indices = @transform_0, window_bounds = array<i64: 1, 18, 8, 256>}, {pipeline_mode = #tpu.pipeline_mode<synchronous>, transform_indices = @transform_1, window_bounds = array<i64: 8, 72>}, {pipeline_mode = #tpu.pipeline_mode<synchronous>, transform_indices = @transform_2, window_bounds = array<i64: 8, 1>}, {transform_indices = @transform_3, window_bounds = array<i64: 1, 8, 8, 128>}]} {
    %c0 = arith.constant 0 : index
    %c0_0 = arith.constant 0 : index
    %0 = vector.load %arg3[%c0, %c0_0] : memref<8x72xf32, #tpu.memory_space<vmem>>, vector<8x72xf32>
    %c0_1 = arith.constant 0 : index
    %c0_2 = arith.constant 0 : index
    %1 = vector.load %arg4[%c0_1, %c0_2] : memref<8x1xf32, #tpu.memory_space<vmem>>, vector<8x1xf32>
    %c8_i32 = arith.constant 8 : i32
    %2 = arith.muli %arg1, %c8_i32 : i32
    %c0_i32 = arith.constant 0 : i32
    %3 = arith.addi %2, %c0_i32 : i32
    %c1_i32 = arith.constant 1 : i32
    %4 = arith.muli %3, %c1_i32 : i32
    %c0_i32_3 = arith.constant 0 : i32
    %5 = arith.addi %4, %c0_i32_3 : i32
    %c0_4 = arith.constant 0 : index
    %6 = arith.index_cast %5 : i32 to index
    %c0_5 = arith.constant 0 : index
    %c0_6 = arith.constant 0 : index
    %7 = vector.load %arg2[%c0_4, %6, %c0_5, %c0_6] : memref<1x18x8x256xf32, #tpu.memory_space<vmem>>, vector<1x1x8x256xf32>
    %8 = vector.shape_cast %7 : vector<1x1x8x256xf32> to vector<8x256xf32>
    %9 = vector.extract_strided_slice %8 {offsets = [0, 0], sizes = [8, 128], strides = [1, 1]} : vector<8x256xf32> to vector<8x128xf32>
    %10 = vector.extract_strided_slice %8 {offsets = [0, 1], sizes = [8, 128], strides = [1, 1]} : vector<8x256xf32> to vector<8x128xf32>
    %11 = vector.extract_strided_slice %8 {offsets = [0, 2], sizes = [8, 128], strides = [1, 1]} : vector<8x256xf32> to vector<8x128xf32>
    %c1_i32_7 = arith.constant 1 : i32
    %12 = arith.muli %3, %c1_i32_7 : i32
    %c1_i32_8 = arith.constant 1 : i32
    %13 = arith.addi %12, %c1_i32_8 : i32
    %c0_9 = arith.constant 0 : index
    %14 = arith.index_cast %13 : i32 to index
    %c0_10 = arith.constant 0 : index
    %c0_11 = arith.constant 0 : index
    %15 = vector.load %arg2[%c0_9, %14, %c0_10, %c0_11] : memref<1x18x8x256xf32, #tpu.memory_space<vmem>>, vector<1x1x8x256xf32>
    %16 = vector.shape_cast %15 : vector<1x1x8x256xf32> to vector<8x256xf32>
    %17 = vector.extract_strided_slice %16 {offsets = [0, 0], sizes = [8, 128], strides = [1, 1]} : vector<8x256xf32> to vector<8x128xf32>
    %18 = vector.extract_strided_slice %16 {offsets = [0, 1], sizes = [8, 128], strides = [1, 1]} : vector<8x256xf32> to vector<8x128xf32>
    %19 = vector.extract_strided_slice %16 {offsets = [0, 2], sizes = [8, 128], strides = [1, 1]} : vector<8x256xf32> to vector<8x128xf32>
    %c1_i32_12 = arith.constant 1 : i32
    %20 = arith.muli %3, %c1_i32_12 : i32
    %c2_i32 = arith.constant 2 : i32
    %21 = arith.addi %20, %c2_i32 : i32
    %c0_13 = arith.constant 0 : index
    %22 = arith.index_cast %21 : i32 to index
    %c0_14 = arith.constant 0 : index
    %c0_15 = arith.constant 0 : index
    %23 = vector.load %arg2[%c0_13, %22, %c0_14, %c0_15] : memref<1x18x8x256xf32, #tpu.memory_space<vmem>>, vector<1x1x8x256xf32>
    %24 = vector.shape_cast %23 : vector<1x1x8x256xf32> to vector<8x256xf32>
    %25 = vector.extract_strided_slice %24 {offsets = [0, 0], sizes = [8, 128], strides = [1, 1]} : vector<8x256xf32> to vector<8x128xf32>
    %26 = vector.extract_strided_slice %24 {offsets = [0, 1], sizes = [8, 128], strides = [1, 1]} : vector<8x256xf32> to vector<8x128xf32>
    %27 = vector.extract_strided_slice %24 {offsets = [0, 2], sizes = [8, 128], strides = [1, 1]} : vector<8x256xf32> to vector<8x128xf32>
    %28 = tpu.concatenate %9, %10, %11, %17, %18, %19, %25, %26, %27 in 0 : vector<8x128xf32>, vector<8x128xf32>, vector<8x128xf32>, vector<8x128xf32>, vector<8x128xf32>, vector<8x128xf32>, vector<8x128xf32>, vector<8x128xf32>, vector<8x128xf32> -> vector<72x128xf32>
    %cst = arith.constant dense<0.000000e+00> : vector<8x128xf32>
    %29 = tpu.matmul %0, %28, %cst {dimension_numbers = #tpu.dot_dimension_numbers<[1], [0], [0], [1], [0, 0, 1, 1], [], []>} : vector<8x72xf32>, vector<72x128xf32>, vector<8x128xf32> -> vector<8x128xf32>
    %30 = vector.broadcast %1 : vector<8x1xf32> to vector<8x128xf32>
    %31 = arith.addf %29, %30 : vector<8x128xf32>
    %c0_16 = arith.constant 0 : index
    %c0_17 = arith.constant 0 : index
    %c0_18 = arith.constant 0 : index
    %c0_19 = arith.constant 0 : index
    %32 = vector.load %arg5[%c0_16, %c0_17, %c0_18, %c0_19] : memref<1x8x8x128xf32, #tpu.memory_space<vmem>>, vector<1x1x8x128xf32>
    %33 = vector.shape_cast %32 : vector<1x1x8x128xf32> to vector<8x128xf32>
    %34 = vector.shape_cast %31 : vector<8x128xf32> to vector<1x1x8x128xf32>
    tpu.vector_store %arg5[%c0_16, %c0_17, %c0_18, %c0_19], %34 {strides = array<i32>} : memref<1x8x8x128xf32, #tpu.memory_space<vmem>>, vector<1x1x8x128xf32>,
    %c8_i32_20 = arith.constant 8 : i32
    %35 = arith.muli %arg1, %c8_i32_20 : i32
    %c1_i32_21 = arith.constant 1 : i32
    %36 = arith.addi %35, %c1_i32_21 : i32
    %c1_i32_22 = arith.constant 1 : i32
    %37 = arith.muli %36, %c1_i32_22 : i32
    %c0_i32_23 = arith.constant 0 : i32
    %38 = arith.addi %37, %c0_i32_23 : i32
    %c0_24 = arith.constant 0 : index
    %39 = arith.index_cast %38 : i32 to index
    %c0_25 = arith.constant 0 : index
    %c0_26 = arith.constant 0 : index
    %40 = vector.load %arg2[%c0_24, %39, %c0_25, %c0_26] : memref<1x18x8x256xf32, #tpu.memory_space<vmem>>, vector<1x1x8x256xf32>
    %41 = vector.shape_cast %40 : vector<1x1x8x256xf32> to vector<8x256xf32>
    %42 = vector.extract_strided_slice %41 {offsets = [0, 0], sizes = [8, 128], strides = [1, 1]} : vector<8x256xf32> to vector<8x128xf32>
    %43 = vector.extract_strided_slice %41 {offsets = [0, 1], sizes = [8, 128], strides = [1, 1]} : vector<8x256xf32> to vector<8x128xf32>
    %44 = vector.extract_strided_slice %41 {offsets = [0, 2], sizes = [8, 128], strides = [1, 1]} : vector<8x256xf32> to vector<8x128xf32>
    %c1_i32_27 = arith.constant 1 : i32
    %45 = arith.muli %36, %c1_i32_27 : i32
    %c1_i32_28 = arith.constant 1 : i32
    %46 = arith.addi %45, %c1_i32_28 : i32
    %c0_29 = arith.constant 0 : index
    %47 = arith.index_cast %46 : i32 to index
    %c0_30 = arith.constant 0 : index
    %c0_31 = arith.constant 0 : index
    %48 = vector.load %arg2[%c0_29, %47, %c0_30, %c0_31] : memref<1x18x8x256xf32, #tpu.memory_space<vmem>>, vector<1x1x8x256xf32>
    %49 = vector.shape_cast %48 : vector<1x1x8x256xf32> to vector<8x256xf32>
    %50 = vector.extract_strided_slice %49 {offsets = [0, 0], sizes = [8, 128], strides = [1, 1]} : vector<8x256xf32> to vector<8x128xf32>
    %51 = vector.extract_strided_slice %49 {offsets = [0, 1], sizes = [8, 128], strides = [1, 1]} : vector<8x256xf32> to vector<8x128xf32>
    %52 = vector.extract_strided_slice %49 {offsets = [0, 2], sizes = [8, 128], strides = [1, 1]} : vector<8x256xf32> to vector<8x128xf32>
    %c1_i32_32 = arith.constant 1 : i32
    %53 = arith.muli %36, %c1_i32_32 : i32
    %c2_i32_33 = arith.constant 2 : i32
    %54 = arith.addi %53, %c2_i32_33 : i32
    %c0_34 = arith.constant 0 : index
    %55 = arith.index_cast %54 : i32 to index
    %c0_35 = arith.constant 0 : index
    %c0_36 = arith.constant 0 : index
    %56 = vector.load %arg2[%c0_34, %55, %c0_35, %c0_36] : memref<1x18x8x256xf32, #tpu.memory_space<vmem>>, vector<1x1x8x256xf32>
    %57 = vector.shape_cast %56 : vector<1x1x8x256xf32> to vector<8x256xf32>
    %58 = vector.extract_strided_slice %57 {offsets = [0, 0], sizes = [8, 128], strides = [1, 1]} : vector<8x256xf32> to vector<8x128xf32>
    %59 = vector.extract_strided_slice %57 {offsets = [0, 1], sizes = [8, 128], strides = [1, 1]} : vector<8x256xf32> to vector<8x128xf32>
    %60 = vector.extract_strided_slice %57 {offsets = [0, 2], sizes = [8, 128], strides = [1, 1]} : vector<8x256xf32> to vector<8x128xf32>
    %61 = tpu.concatenate %42, %43, %44, %50, %51, %52, %58, %59, %60 in 0 : vector<8x128xf32>, vector<8x128xf32>, vector<8x128xf32>, vector<8x128xf32>, vector<8x128xf32>, vector<8x128xf32>, vector<8x128xf32>, vector<8x128xf32>, vector<8x128xf32> -> vector<72x128xf32>
    %cst_37 = arith.constant dense<0.000000e+00> : vector<8x128xf32>
    %62 = tpu.matmul %0, %61, %cst_37 {dimension_numbers = #tpu.dot_dimension_numbers<[1], [0], [0], [1], [0, 0, 1, 1], [], []>} : vector<8x72xf32>, vector<72x128xf32>, vector<8x128xf32> -> vector<8x128xf32>
    %63 = vector.broadcast %1 : vector<8x1xf32> to vector<8x128xf32>
    %64 = arith.addf %62, %63 : vector<8x128xf32>
    %c0_38 = arith.constant 0 : index
    %c1 = arith.constant 1 : index
    %c0_39 = arith.constant 0 : index
    %c0_40 = arith.constant 0 : index
    %65 = vector.load %arg5[%c0_38, %c1, %c0_39, %c0_40] : memref<1x8x8x128xf32, #tpu.memory_space<vmem>>, vector<1x1x8x128xf32>
    %66 = vector.shape_cast %65 : vector<1x1x8x128xf32> to vector<8x128xf32>
    %67 = vector.shape_cast %64 : vector<8x128xf32> to vector<1x1x8x128xf32>
    tpu.vector_store %arg5[%c0_38, %c1, %c0_39, %c0_40], %67 {strides = array<i32>} : memref<1x8x8x128xf32, #tpu.memory_space<vmem>>, vector<1x1x8x128xf32>,
    %c8_i32_41 = arith.constant 8 : i32
    %68 = arith.muli %arg1, %c8_i32_41 : i32
    %c2_i32_42 = arith.constant 2 : i32
    %69 = arith.addi %68, %c2_i32_42 : i32
    %c1_i32_43 = arith.constant 1 : i32
    %70 = arith.muli %69, %c1_i32_43 : i32
    %c0_i32_44 = arith.constant 0 : i32
    %71 = arith.addi %70, %c0_i32_44 : i32
    %c0_45 = arith.constant 0 : index
    %72 = arith.index_cast %71 : i32 to index
    %c0_46 = arith.constant 0 : index
    %c0_47 = arith.constant 0 : index
    %73 = vector.load %arg2[%c0_45, %72, %c0_46, %c0_47] : memref<1x18x8x256xf32, #tpu.memory_space<vmem>>, vector<1x1x8x256xf32>
    %74 = vector.shape_cast %73 : vector<1x1x8x256xf32> to vector<8x256xf32>
    %75 = vector.extract_strided_slice %74 {offsets = [0, 0], sizes = [8, 128], strides = [1, 1]} : vector<8x256xf32> to vector<8x128xf32>
    %76 = vector.extract_strided_slice %74 {offsets = [0, 1], sizes = [8, 128], strides = [1, 1]} : vector<8x256xf32> to vector<8x128xf32>
    %77 = vector.extract_strided_slice %74 {offsets = [0, 2], sizes = [8, 128], strides = [1, 1]} : vector<8x256xf32> to vector<8x128xf32>
    %c1_i32_48 = arith.constant 1 : i32
    %78 = arith.muli %69, %c1_i32_48 : i32
    %c1_i32_49 = arith.constant 1 : i32
    %79 = arith.addi %78, %c1_i32_49 : i32
    %c0_50 = arith.constant 0 : index
    %80 = arith.index_cast %79 : i32 to index
    %c0_51 = arith.constant 0 : index
    %c0_52 = arith.constant 0 : index
    %81 = vector.load %arg2[%c0_50, %80, %c0_51, %c0_52] : memref<1x18x8x256xf32, #tpu.memory_space<vmem>>, vector<1x1x8x256xf32>
    %82 = vector.shape_cast %81 : vector<1x1x8x256xf32> to vector<8x256xf32>
    %83 = vector.extract_strided_slice %82 {offsets = [0, 0], sizes = [8, 128], strides = [1, 1]} : vector<8x256xf32> to vector<8x128xf32>
    %84 = vector.extract_strided_slice %82 {offsets = [0, 1], sizes = [8, 128], strides = [1, 1]} : vector<8x256xf32> to vector<8x128xf32>
    %85 = vector.extract_strided_slice %82 {offsets = [0, 2], sizes = [8, 128], strides = [1, 1]} : vector<8x256xf32> to vector<8x128xf32>
    %c1_i32_53 = arith.constant 1 : i32
    %86 = arith.muli %69, %c1_i32_53 : i32
    %c2_i32_54 = arith.constant 2 : i32
    %87 = arith.addi %86, %c2_i32_54 : i32
    %c0_55 = arith.constant 0 : index
    %88 = arith.index_cast %87 : i32 to index
    %c0_56 = arith.constant 0 : index
    %c0_57 = arith.constant 0 : index
    %89 = vector.load %arg2[%c0_55, %88, %c0_56, %c0_57] : memref<1x18x8x256xf32, #tpu.memory_space<vmem>>, vector<1x1x8x256xf32>
    %90 = vector.shape_cast %89 : vector<1x1x8x256xf32> to vector<8x256xf32>
    %91 = vector.extract_strided_slice %90 {offsets = [0, 0], sizes = [8, 128], strides = [1, 1]} : vector<8x256xf32> to vector<8x128xf32>
    %92 = vector.extract_strided_slice %90 {offsets = [0, 1], sizes = [8, 128], strides = [1, 1]} : vector<8x256xf32> to vector<8x128xf32>
    %93 = vector.extract_strided_slice %90 {offsets = [0, 2], sizes = [8, 128], strides = [1, 1]} : vector<8x256xf32> to vector<8x128xf32>
    %94 = tpu.concatenate %75, %76, %77, %83, %84, %85, %91, %92, %93 in 0 : vector<8x128xf32>, vector<8x128xf32>, vector<8x128xf32>, vector<8x128xf32>, vector<8x128xf32>, vector<8x128xf32>, vector<8x128xf32>, vector<8x128xf32>, vector<8x128xf32> -> vector<72x128xf32>
    %cst_58 = arith.constant dense<0.000000e+00> : vector<8x128xf32>
    %95 = tpu.matmul %0, %94, %cst_58 {dimension_numbers = #tpu.dot_dimension_numbers<[1], [0], [0], [1], [0, 0, 1, 1], [], []>} : vector<8x72xf32>, vector<72x128xf32>, vector<8x128xf32> -> vector<8x128xf32>
    %96 = vector.broadcast %1 : vector<8x1xf32> to vector<8x128xf32>
    %97 = arith.addf %95, %96 : vector<8x128xf32>
    %c0_59 = arith.constant 0 : index
    %c2 = arith.constant 2 : index
    %c0_60 = arith.constant 0 : index
    %c0_61 = arith.constant 0 : index
    %98 = vector.load %arg5[%c0_59, %c2, %c0_60, %c0_61] : memref<1x8x8x128xf32, #tpu.memory_space<vmem>>, vector<1x1x8x128xf32>
    %99 = vector.shape_cast %98 : vector<1x1x8x128xf32> to vector<8x128xf32>
    %100 = vector.shape_cast %97 : vector<8x128xf32> to vector<1x1x8x128xf32>
    tpu.vector_store %arg5[%c0_59, %c2, %c0_60, %c0_61], %100 {strides = array<i32>} : memref<1x8x8x128xf32, #tpu.memory_space<vmem>>, vector<1x1x8x128xf32>,
    %c8_i32_62 = arith.constant 8 : i32
    %101 = arith.muli %arg1, %c8_i32_62 : i32
    %c3_i32 = arith.constant 3 : i32
    %102 = arith.addi %101, %c3_i32 : i32
    %c1_i32_63 = arith.constant 1 : i32
    %103 = arith.muli %102, %c1_i32_63 : i32
    %c0_i32_64 = arith.constant 0 : i32
    %104 = arith.addi %103, %c0_i32_64 : i32
    %c0_65 = arith.constant 0 : index
    %105 = arith.index_cast %104 : i32 to index
    %c0_66 = arith.constant 0 : index
    %c0_67 = arith.constant 0 : index
    %106 = vector.load %arg2[%c0_65, %105, %c0_66, %c0_67] : memref<1x18x8x256xf32, #tpu.memory_space<vmem>>, vector<1x1x8x256xf32>
    %107 = vector.shape_cast %106 : vector<1x1x8x256xf32> to vector<8x256xf32>
    %108 = vector.extract_strided_slice %107 {offsets = [0, 0], sizes = [8, 128], strides = [1, 1]} : vector<8x256xf32> to vector<8x128xf32>
    %109 = vector.extract_strided_slice %107 {offsets = [0, 1], sizes = [8, 128], strides = [1, 1]} : vector<8x256xf32> to vector<8x128xf32>
    %110 = vector.extract_strided_slice %107 {offsets = [0, 2], sizes = [8, 128], strides = [1, 1]} : vector<8x256xf32> to vector<8x128xf32>
    %c1_i32_68 = arith.constant 1 : i32
    %111 = arith.muli %102, %c1_i32_68 : i32
    %c1_i32_69 = arith.constant 1 : i32
    %112 = arith.addi %111, %c1_i32_69 : i32
    %c0_70 = arith.constant 0 : index
    %113 = arith.index_cast %112 : i32 to index
    %c0_71 = arith.constant 0 : index
    %c0_72 = arith.constant 0 : index
    %114 = vector.load %arg2[%c0_70, %113, %c0_71, %c0_72] : memref<1x18x8x256xf32, #tpu.memory_space<vmem>>, vector<1x1x8x256xf32>
    %115 = vector.shape_cast %114 : vector<1x1x8x256xf32> to vector<8x256xf32>
    %116 = vector.extract_strided_slice %115 {offsets = [0, 0], sizes = [8, 128], strides = [1, 1]} : vector<8x256xf32> to vector<8x128xf32>
    %117 = vector.extract_strided_slice %115 {offsets = [0, 1], sizes = [8, 128], strides = [1, 1]} : vector<8x256xf32> to vector<8x128xf32>
    %118 = vector.extract_strided_slice %115 {offsets = [0, 2], sizes = [8, 128], strides = [1, 1]} : vector<8x256xf32> to vector<8x128xf32>
    %c1_i32_73 = arith.constant 1 : i32
    %119 = arith.muli %102, %c1_i32_73 : i32
    %c2_i32_74 = arith.constant 2 : i32
    %120 = arith.addi %119, %c2_i32_74 : i32
    %c0_75 = arith.constant 0 : index
    %121 = arith.index_cast %120 : i32 to index
    %c0_76 = arith.constant 0 : index
    %c0_77 = arith.constant 0 : index
    %122 = vector.load %arg2[%c0_75, %121, %c0_76, %c0_77] : memref<1x18x8x256xf32, #tpu.memory_space<vmem>>, vector<1x1x8x256xf32>
    %123 = vector.shape_cast %122 : vector<1x1x8x256xf32> to vector<8x256xf32>
    %124 = vector.extract_strided_slice %123 {offsets = [0, 0], sizes = [8, 128], strides = [1, 1]} : vector<8x256xf32> to vector<8x128xf32>
    %125 = vector.extract_strided_slice %123 {offsets = [0, 1], sizes = [8, 128], strides = [1, 1]} : vector<8x256xf32> to vector<8x128xf32>
    %126 = vector.extract_strided_slice %123 {offsets = [0, 2], sizes = [8, 128], strides = [1, 1]} : vector<8x256xf32> to vector<8x128xf32>
    %127 = tpu.concatenate %108, %109, %110, %116, %117, %118, %124, %125, %126 in 0 : vector<8x128xf32>, vector<8x128xf32>, vector<8x128xf32>, vector<8x128xf32>, vector<8x128xf32>, vector<8x128xf32>, vector<8x128xf32>, vector<8x128xf32>, vector<8x128xf32> -> vector<72x128xf32>
    %cst_78 = arith.constant dense<0.000000e+00> : vector<8x128xf32>
    %128 = tpu.matmul %0, %127, %cst_78 {dimension_numbers = #tpu.dot_dimension_numbers<[1], [0], [0], [1], [0, 0, 1, 1], [], []>} : vector<8x72xf32>, vector<72x128xf32>, vector<8x128xf32> -> vector<8x128xf32>
    %129 = vector.broadcast %1 : vector<8x1xf32> to vector<8x128xf32>
    %130 = arith.addf %128, %129 : vector<8x128xf32>
    %c0_79 = arith.constant 0 : index
    %c3 = arith.constant 3 : index
    %c0_80 = arith.constant 0 : index
    %c0_81 = arith.constant 0 : index
    %131 = vector.load %arg5[%c0_79, %c3, %c0_80, %c0_81] : memref<1x8x8x128xf32, #tpu.memory_space<vmem>>, vector<1x1x8x128xf32>
    %132 = vector.shape_cast %131 : vector<1x1x8x128xf32> to vector<8x128xf32>
    %133 = vector.shape_cast %130 : vector<8x128xf32> to vector<1x1x8x128xf32>
    tpu.vector_store %arg5[%c0_79, %c3, %c0_80, %c0_81], %133 {strides = array<i32>} : memref<1x8x8x128xf32, #tpu.memory_space<vmem>>, vector<1x1x8x128xf32>,
    %c8_i32_82 = arith.constant 8 : i32
    %134 = arith.muli %arg1, %c8_i32_82 : i32
    %c4_i32 = arith.constant 4 : i32
    %135 = arith.addi %134, %c4_i32 : i32
    %c1_i32_83 = arith.constant 1 : i32
    %136 = arith.muli %135, %c1_i32_83 : i32
    %c0_i32_84 = arith.constant 0 : i32
    %137 = arith.addi %136, %c0_i32_84 : i32
    %c0_85 = arith.constant 0 : index
    %138 = arith.index_cast %137 : i32 to index
    %c0_86 = arith.constant 0 : index
    %c0_87 = arith.constant 0 : index
    %139 = vector.load %arg2[%c0_85, %138, %c0_86, %c0_87] : memref<1x18x8x256xf32, #tpu.memory_space<vmem>>, vector<1x1x8x256xf32>
    %140 = vector.shape_cast %139 : vector<1x1x8x256xf32> to vector<8x256xf32>
    %141 = vector.extract_strided_slice %140 {offsets = [0, 0], sizes = [8, 128], strides = [1, 1]} : vector<8x256xf32> to vector<8x128xf32>
    %142 = vector.extract_strided_slice %140 {offsets = [0, 1], sizes = [8, 128], strides = [1, 1]} : vector<8x256xf32> to vector<8x128xf32>
    %143 = vector.extract_strided_slice %140 {offsets = [0, 2], sizes = [8, 128], strides = [1, 1]} : vector<8x256xf32> to vector<8x128xf32>
    %c1_i32_88 = arith.constant 1 : i32
    %144 = arith.muli %135, %c1_i32_88 : i32
    %c1_i32_89 = arith.constant 1 : i32
    %145 = arith.addi %144, %c1_i32_89 : i32
    %c0_90 = arith.constant 0 : index
    %146 = arith.index_cast %145 : i32 to index
    %c0_91 = arith.constant 0 : index
    %c0_92 = arith.constant 0 : index
    %147 = vector.load %arg2[%c0_90, %146, %c0_91, %c0_92] : memref<1x18x8x256xf32, #tpu.memory_space<vmem>>, vector<1x1x8x256xf32>
    %148 = vector.shape_cast %147 : vector<1x1x8x256xf32> to vector<8x256xf32>
    %149 = vector.extract_strided_slice %148 {offsets = [0, 0], sizes = [8, 128], strides = [1, 1]} : vector<8x256xf32> to vector<8x128xf32>
    %150 = vector.extract_strided_slice %148 {offsets = [0, 1], sizes = [8, 128], strides = [1, 1]} : vector<8x256xf32> to vector<8x128xf32>
    %151 = vector.extract_strided_slice %148 {offsets = [0, 2], sizes = [8, 128], strides = [1, 1]} : vector<8x256xf32> to vector<8x128xf32>
    %c1_i32_93 = arith.constant 1 : i32
    %152 = arith.muli %135, %c1_i32_93 : i32
    %c2_i32_94 = arith.constant 2 : i32
    %153 = arith.addi %152, %c2_i32_94 : i32
    %c0_95 = arith.constant 0 : index
    %154 = arith.index_cast %153 : i32 to index
    %c0_96 = arith.constant 0 : index
    %c0_97 = arith.constant 0 : index
    %155 = vector.load %arg2[%c0_95, %154, %c0_96, %c0_97] : memref<1x18x8x256xf32, #tpu.memory_space<vmem>>, vector<1x1x8x256xf32>
    %156 = vector.shape_cast %155 : vector<1x1x8x256xf32> to vector<8x256xf32>
    %157 = vector.extract_strided_slice %156 {offsets = [0, 0], sizes = [8, 128], strides = [1, 1]} : vector<8x256xf32> to vector<8x128xf32>
    %158 = vector.extract_strided_slice %156 {offsets = [0, 1], sizes = [8, 128], strides = [1, 1]} : vector<8x256xf32> to vector<8x128xf32>
    %159 = vector.extract_strided_slice %156 {offsets = [0, 2], sizes = [8, 128], strides = [1, 1]} : vector<8x256xf32> to vector<8x128xf32>
    %160 = tpu.concatenate %141, %142, %143, %149, %150, %151, %157, %158, %159 in 0 : vector<8x128xf32>, vector<8x128xf32>, vector<8x128xf32>, vector<8x128xf32>, vector<8x128xf32>, vector<8x128xf32>, vector<8x128xf32>, vector<8x128xf32>, vector<8x128xf32> -> vector<72x128xf32>
    %cst_98 = arith.constant dense<0.000000e+00> : vector<8x128xf32>
    %161 = tpu.matmul %0, %160, %cst_98 {dimension_numbers = #tpu.dot_dimension_numbers<[1], [0], [0], [1], [0, 0, 1, 1], [], []>} : vector<8x72xf32>, vector<72x128xf32>, vector<8x128xf32> -> vector<8x128xf32>
    %162 = vector.broadcast %1 : vector<8x1xf32> to vector<8x128xf32>
    %163 = arith.addf %161, %162 : vector<8x128xf32>
    %c0_99 = arith.constant 0 : index
    %c4 = arith.constant 4 : index
    %c0_100 = arith.constant 0 : index
    %c0_101 = arith.constant 0 : index
    %164 = vector.load %arg5[%c0_99, %c4, %c0_100, %c0_101] : memref<1x8x8x128xf32, #tpu.memory_space<vmem>>, vector<1x1x8x128xf32>
    %165 = vector.shape_cast %164 : vector<1x1x8x128xf32> to vector<8x128xf32>
    %166 = vector.shape_cast %163 : vector<8x128xf32> to vector<1x1x8x128xf32>
    tpu.vector_store %arg5[%c0_99, %c4, %c0_100, %c0_101], %166 {strides = array<i32>} : memref<1x8x8x128xf32, #tpu.memory_space<vmem>>, vector<1x1x8x128xf32>,
    %c8_i32_102 = arith.constant 8 : i32
    %167 = arith.muli %arg1, %c8_i32_102 : i32
    %c5_i32 = arith.constant 5 : i32
    %168 = arith.addi %167, %c5_i32 : i32
    %c1_i32_103 = arith.constant 1 : i32
    %169 = arith.muli %168, %c1_i32_103 : i32
    %c0_i32_104 = arith.constant 0 : i32
    %170 = arith.addi %169, %c0_i32_104 : i32
    %c0_105 = arith.constant 0 : index
    %171 = arith.index_cast %170 : i32 to index
    %c0_106 = arith.constant 0 : index
    %c0_107 = arith.constant 0 : index
    %172 = vector.load %arg2[%c0_105, %171, %c0_106, %c0_107] : memref<1x18x8x256xf32, #tpu.memory_space<vmem>>, vector<1x1x8x256xf32>
    %173 = vector.shape_cast %172 : vector<1x1x8x256xf32> to vector<8x256xf32>
    %174 = vector.extract_strided_slice %173 {offsets = [0, 0], sizes = [8, 128], strides = [1, 1]} : vector<8x256xf32> to vector<8x128xf32>
    %175 = vector.extract_strided_slice %173 {offsets = [0, 1], sizes = [8, 128], strides = [1, 1]} : vector<8x256xf32> to vector<8x128xf32>
    %176 = vector.extract_strided_slice %173 {offsets = [0, 2], sizes = [8, 128], strides = [1, 1]} : vector<8x256xf32> to vector<8x128xf32>
    %c1_i32_108 = arith.constant 1 : i32
    %177 = arith.muli %168, %c1_i32_108 : i32
    %c1_i32_109 = arith.constant 1 : i32
    %178 = arith.addi %177, %c1_i32_109 : i32
    %c0_110 = arith.constant 0 : index
    %179 = arith.index_cast %178 : i32 to index
    %c0_111 = arith.constant 0 : index
    %c0_112 = arith.constant 0 : index
    %180 = vector.load %arg2[%c0_110, %179, %c0_111, %c0_112] : memref<1x18x8x256xf32, #tpu.memory_space<vmem>>, vector<1x1x8x256xf32>
    %181 = vector.shape_cast %180 : vector<1x1x8x256xf32> to vector<8x256xf32>
    %182 = vector.extract_strided_slice %181 {offsets = [0, 0], sizes = [8, 128], strides = [1, 1]} : vector<8x256xf32> to vector<8x128xf32>
    %183 = vector.extract_strided_slice %181 {offsets = [0, 1], sizes = [8, 128], strides = [1, 1]} : vector<8x256xf32> to vector<8x128xf32>
    %184 = vector.extract_strided_slice %181 {offsets = [0, 2], sizes = [8, 128], strides = [1, 1]} : vector<8x256xf32> to vector<8x128xf32>
    %c1_i32_113 = arith.constant 1 : i32
    %185 = arith.muli %168, %c1_i32_113 : i32
    %c2_i32_114 = arith.constant 2 : i32
    %186 = arith.addi %185, %c2_i32_114 : i32
    %c0_115 = arith.constant 0 : index
    %187 = arith.index_cast %186 : i32 to index
    %c0_116 = arith.constant 0 : index
    %c0_117 = arith.constant 0 : index
    %188 = vector.load %arg2[%c0_115, %187, %c0_116, %c0_117] : memref<1x18x8x256xf32, #tpu.memory_space<vmem>>, vector<1x1x8x256xf32>
    %189 = vector.shape_cast %188 : vector<1x1x8x256xf32> to vector<8x256xf32>
    %190 = vector.extract_strided_slice %189 {offsets = [0, 0], sizes = [8, 128], strides = [1, 1]} : vector<8x256xf32> to vector<8x128xf32>
    %191 = vector.extract_strided_slice %189 {offsets = [0, 1], sizes = [8, 128], strides = [1, 1]} : vector<8x256xf32> to vector<8x128xf32>
    %192 = vector.extract_strided_slice %189 {offsets = [0, 2], sizes = [8, 128], strides = [1, 1]} : vector<8x256xf32> to vector<8x128xf32>
    %193 = tpu.concatenate %174, %175, %176, %182, %183, %184, %190, %191, %192 in 0 : vector<8x128xf32>, vector<8x128xf32>, vector<8x128xf32>, vector<8x128xf32>, vector<8x128xf32>, vector<8x128xf32>, vector<8x128xf32>, vector<8x128xf32>, vector<8x128xf32> -> vector<72x128xf32>
    %cst_118 = arith.constant dense<0.000000e+00> : vector<8x128xf32>
    %194 = tpu.matmul %0, %193, %cst_118 {dimension_numbers = #tpu.dot_dimension_numbers<[1], [0], [0], [1], [0, 0, 1, 1], [], []>} : vector<8x72xf32>, vector<72x128xf32>, vector<8x128xf32> -> vector<8x128xf32>
    %195 = vector.broadcast %1 : vector<8x1xf32> to vector<8x128xf32>
    %196 = arith.addf %194, %195 : vector<8x128xf32>
    %c0_119 = arith.constant 0 : index
    %c5 = arith.constant 5 : index
    %c0_120 = arith.constant 0 : index
    %c0_121 = arith.constant 0 : index
    %197 = vector.load %arg5[%c0_119, %c5, %c0_120, %c0_121] : memref<1x8x8x128xf32, #tpu.memory_space<vmem>>, vector<1x1x8x128xf32>
    %198 = vector.shape_cast %197 : vector<1x1x8x128xf32> to vector<8x128xf32>
    %199 = vector.shape_cast %196 : vector<8x128xf32> to vector<1x1x8x128xf32>
    tpu.vector_store %arg5[%c0_119, %c5, %c0_120, %c0_121], %199 {strides = array<i32>} : memref<1x8x8x128xf32, #tpu.memory_space<vmem>>, vector<1x1x8x128xf32>,
    %c8_i32_122 = arith.constant 8 : i32
    %200 = arith.muli %arg1, %c8_i32_122 : i32
    %c6_i32 = arith.constant 6 : i32
    %201 = arith.addi %200, %c6_i32 : i32
    %c1_i32_123 = arith.constant 1 : i32
    %202 = arith.muli %201, %c1_i32_123 : i32
    %c0_i32_124 = arith.constant 0 : i32
    %203 = arith.addi %202, %c0_i32_124 : i32
    %c0_125 = arith.constant 0 : index
    %204 = arith.index_cast %203 : i32 to index
    %c0_126 = arith.constant 0 : index
    %c0_127 = arith.constant 0 : index
    %205 = vector.load %arg2[%c0_125, %204, %c0_126, %c0_127] : memref<1x18x8x256xf32, #tpu.memory_space<vmem>>, vector<1x1x8x256xf32>
    %206 = vector.shape_cast %205 : vector<1x1x8x256xf32> to vector<8x256xf32>
    %207 = vector.extract_strided_slice %206 {offsets = [0, 0], sizes = [8, 128], strides = [1, 1]} : vector<8x256xf32> to vector<8x128xf32>
    %208 = vector.extract_strided_slice %206 {offsets = [0, 1], sizes = [8, 128], strides = [1, 1]} : vector<8x256xf32> to vector<8x128xf32>
    %209 = vector.extract_strided_slice %206 {offsets = [0, 2], sizes = [8, 128], strides = [1, 1]} : vector<8x256xf32> to vector<8x128xf32>
    %c1_i32_128 = arith.constant 1 : i32
    %210 = arith.muli %201, %c1_i32_128 : i32
    %c1_i32_129 = arith.constant 1 : i32
    %211 = arith.addi %210, %c1_i32_129 : i32
    %c0_130 = arith.constant 0 : index
    %212 = arith.index_cast %211 : i32 to index
    %c0_131 = arith.constant 0 : index
    %c0_132 = arith.constant 0 : index
    %213 = vector.load %arg2[%c0_130, %212, %c0_131, %c0_132] : memref<1x18x8x256xf32, #tpu.memory_space<vmem>>, vector<1x1x8x256xf32>
    %214 = vector.shape_cast %213 : vector<1x1x8x256xf32> to vector<8x256xf32>
    %215 = vector.extract_strided_slice %214 {offsets = [0, 0], sizes = [8, 128], strides = [1, 1]} : vector<8x256xf32> to vector<8x128xf32>
    %216 = vector.extract_strided_slice %214 {offsets = [0, 1], sizes = [8, 128], strides = [1, 1]} : vector<8x256xf32> to vector<8x128xf32>
    %217 = vector.extract_strided_slice %214 {offsets = [0, 2], sizes = [8, 128], strides = [1, 1]} : vector<8x256xf32> to vector<8x128xf32>
    %c1_i32_133 = arith.constant 1 : i32
    %218 = arith.muli %201, %c1_i32_133 : i32
    %c2_i32_134 = arith.constant 2 : i32
    %219 = arith.addi %218, %c2_i32_134 : i32
    %c0_135 = arith.constant 0 : index
    %220 = arith.index_cast %219 : i32 to index
    %c0_136 = arith.constant 0 : index
    %c0_137 = arith.constant 0 : index
    %221 = vector.load %arg2[%c0_135, %220, %c0_136, %c0_137] : memref<1x18x8x256xf32, #tpu.memory_space<vmem>>, vector<1x1x8x256xf32>
    %222 = vector.shape_cast %221 : vector<1x1x8x256xf32> to vector<8x256xf32>
    %223 = vector.extract_strided_slice %222 {offsets = [0, 0], sizes = [8, 128], strides = [1, 1]} : vector<8x256xf32> to vector<8x128xf32>
    %224 = vector.extract_strided_slice %222 {offsets = [0, 1], sizes = [8, 128], strides = [1, 1]} : vector<8x256xf32> to vector<8x128xf32>
    %225 = vector.extract_strided_slice %222 {offsets = [0, 2], sizes = [8, 128], strides = [1, 1]} : vector<8x256xf32> to vector<8x128xf32>
    %226 = tpu.concatenate %207, %208, %209, %215, %216, %217, %223, %224, %225 in 0 : vector<8x128xf32>, vector<8x128xf32>, vector<8x128xf32>, vector<8x128xf32>, vector<8x128xf32>, vector<8x128xf32>, vector<8x128xf32>, vector<8x128xf32>, vector<8x128xf32> -> vector<72x128xf32>
    %cst_138 = arith.constant dense<0.000000e+00> : vector<8x128xf32>
    %227 = tpu.matmul %0, %226, %cst_138 {dimension_numbers = #tpu.dot_dimension_numbers<[1], [0], [0], [1], [0, 0, 1, 1], [], []>} : vector<8x72xf32>, vector<72x128xf32>, vector<8x128xf32> -> vector<8x128xf32>
    %228 = vector.broadcast %1 : vector<8x1xf32> to vector<8x128xf32>
    %229 = arith.addf %227, %228 : vector<8x128xf32>
    %c0_139 = arith.constant 0 : index
    %c6 = arith.constant 6 : index
    %c0_140 = arith.constant 0 : index
    %c0_141 = arith.constant 0 : index
    %230 = vector.load %arg5[%c0_139, %c6, %c0_140, %c0_141] : memref<1x8x8x128xf32, #tpu.memory_space<vmem>>, vector<1x1x8x128xf32>
    %231 = vector.shape_cast %230 : vector<1x1x8x128xf32> to vector<8x128xf32>
    %232 = vector.shape_cast %229 : vector<8x128xf32> to vector<1x1x8x128xf32>
    tpu.vector_store %arg5[%c0_139, %c6, %c0_140, %c0_141], %232 {strides = array<i32>} : memref<1x8x8x128xf32, #tpu.memory_space<vmem>>, vector<1x1x8x128xf32>,
    %c8_i32_142 = arith.constant 8 : i32
    %233 = arith.muli %arg1, %c8_i32_142 : i32
    %c7_i32 = arith.constant 7 : i32
    %234 = arith.addi %233, %c7_i32 : i32
    %c1_i32_143 = arith.constant 1 : i32
    %235 = arith.muli %234, %c1_i32_143 : i32
    %c0_i32_144 = arith.constant 0 : i32
    %236 = arith.addi %235, %c0_i32_144 : i32
    %c0_145 = arith.constant 0 : index
    %237 = arith.index_cast %236 : i32 to index
    %c0_146 = arith.constant 0 : index
    %c0_147 = arith.constant 0 : index
    %238 = vector.load %arg2[%c0_145, %237, %c0_146, %c0_147] : memref<1x18x8x256xf32, #tpu.memory_space<vmem>>, vector<1x1x8x256xf32>
    %239 = vector.shape_cast %238 : vector<1x1x8x256xf32> to vector<8x256xf32>
    %240 = vector.extract_strided_slice %239 {offsets = [0, 0], sizes = [8, 128], strides = [1, 1]} : vector<8x256xf32> to vector<8x128xf32>
    %241 = vector.extract_strided_slice %239 {offsets = [0, 1], sizes = [8, 128], strides = [1, 1]} : vector<8x256xf32> to vector<8x128xf32>
    %242 = vector.extract_strided_slice %239 {offsets = [0, 2], sizes = [8, 128], strides = [1, 1]} : vector<8x256xf32> to vector<8x128xf32>
    %c1_i32_148 = arith.constant 1 : i32
    %243 = arith.muli %234, %c1_i32_148 : i32
    %c1_i32_149 = arith.constant 1 : i32
    %244 = arith.addi %243, %c1_i32_149 : i32
    %c0_150 = arith.constant 0 : index
    %245 = arith.index_cast %244 : i32 to index
    %c0_151 = arith.constant 0 : index
    %c0_152 = arith.constant 0 : index
    %246 = vector.load %arg2[%c0_150, %245, %c0_151, %c0_152] : memref<1x18x8x256xf32, #tpu.memory_space<vmem>>, vector<1x1x8x256xf32>
    %247 = vector.shape_cast %246 : vector<1x1x8x256xf32> to vector<8x256xf32>
    %248 = vector.extract_strided_slice %247 {offsets = [0, 0], sizes = [8, 128], strides = [1, 1]} : vector<8x256xf32> to vector<8x128xf32>
    %249 = vector.extract_strided_slice %247 {offsets = [0, 1], sizes = [8, 128], strides = [1, 1]} : vector<8x256xf32> to vector<8x128xf32>
    %250 = vector.extract_strided_slice %247 {offsets = [0, 2], sizes = [8, 128], strides = [1, 1]} : vector<8x256xf32> to vector<8x128xf32>
    %c1_i32_153 = arith.constant 1 : i32
    %251 = arith.muli %234, %c1_i32_153 : i32
    %c2_i32_154 = arith.constant 2 : i32
    %252 = arith.addi %251, %c2_i32_154 : i32
    %c0_155 = arith.constant 0 : index
    %253 = arith.index_cast %252 : i32 to index
    %c0_156 = arith.constant 0 : index
    %c0_157 = arith.constant 0 : index
    %254 = vector.load %arg2[%c0_155, %253, %c0_156, %c0_157] : memref<1x18x8x256xf32, #tpu.memory_space<vmem>>, vector<1x1x8x256xf32>
    %255 = vector.shape_cast %254 : vector<1x1x8x256xf32> to vector<8x256xf32>
    %256 = vector.extract_strided_slice %255 {offsets = [0, 0], sizes = [8, 128], strides = [1, 1]} : vector<8x256xf32> to vector<8x128xf32>
    %257 = vector.extract_strided_slice %255 {offsets = [0, 1], sizes = [8, 128], strides = [1, 1]} : vector<8x256xf32> to vector<8x128xf32>
    %258 = vector.extract_strided_slice %255 {offsets = [0, 2], sizes = [8, 128], strides = [1, 1]} : vector<8x256xf32> to vector<8x128xf32>
    %259 = tpu.concatenate %240, %241, %242, %248, %249, %250, %256, %257, %258 in 0 : vector<8x128xf32>, vector<8x128xf32>, vector<8x128xf32>, vector<8x128xf32>, vector<8x128xf32>, vector<8x128xf32>, vector<8x128xf32>, vector<8x128xf32>, vector<8x128xf32> -> vector<72x128xf32>
    %cst_158 = arith.constant dense<0.000000e+00> : vector<8x128xf32>
    %260 = tpu.matmul %0, %259, %cst_158 {dimension_numbers = #tpu.dot_dimension_numbers<[1], [0], [0], [1], [0, 0, 1, 1], [], []>} : vector<8x72xf32>, vector<72x128xf32>, vector<8x128xf32> -> vector<8x128xf32>
    %261 = vector.broadcast %1 : vector<8x1xf32> to vector<8x128xf32>
    %262 = arith.addf %260, %261 : vector<8x128xf32>
    %c0_159 = arith.constant 0 : index
    %c7 = arith.constant 7 : index
    %c0_160 = arith.constant 0 : index
    %c0_161 = arith.constant 0 : index
    %263 = vector.load %arg5[%c0_159, %c7, %c0_160, %c0_161] : memref<1x8x8x128xf32, #tpu.memory_space<vmem>>, vector<1x1x8x128xf32>
    %264 = vector.shape_cast %263 : vector<1x1x8x128xf32> to vector<8x128xf32>
    %265 = vector.shape_cast %262 : vector<8x128xf32> to vector<1x1x8x128xf32>
    tpu.vector_store %arg5[%c0_159, %c7, %c0_160, %c0_161], %265 {strides = array<i32>} : memref<1x8x8x128xf32, #tpu.memory_space<vmem>>, vector<1x1x8x128xf32>,
    return
  }
  func.func @transform_0(%arg0: i32, %arg1: i32) -> (i32, i32, i32, i32) {
    %c0_i32 = arith.constant 0 : i32
    %c0_i32_0 = arith.constant 0 : i32
    %c0_i32_1 = arith.constant 0 : i32
    %c0_i32_2 = arith.constant 0 : i32
    return %arg0, %c0_i32, %c0_i32_0, %c0_i32_1 : i32, i32, i32, i32
  }
  func.func @transform_1(%arg0: i32, %arg1: i32) -> (i32, i32) {
    %c0_i32 = arith.constant 0 : i32
    %c0_i32_0 = arith.constant 0 : i32
    %c0_i32_1 = arith.constant 0 : i32
    return %c0_i32, %c0_i32_0 : i32, i32
  }
  func.func @transform_2(%arg0: i32, %arg1: i32) -> (i32, i32) {
    %c0_i32 = arith.constant 0 : i32
    %c0_i32_0 = arith.constant 0 : i32
    %c0_i32_1 = arith.constant 0 : i32
    return %c0_i32, %c0_i32_0 : i32, i32
  }
  func.func @transform_3(%arg0: i32, %arg1: i32) -> (i32, i32, i32, i32) {
    %c0_i32 = arith.constant 0 : i32
    %c0_i32_0 = arith.constant 0 : i32
    %c0_i32_1 = arith.constant 0 : i32
    return %arg0, %arg1, %c0_i32, %c0_i32_0 : i32, i32, i32, i32
  }
}

</mosaic_0001>

<bundles_post_ra>
// kernel: tpu_custom_call.1
= control target key start
LH: loop header
LB: loop body
LE: loop exit
PB: predicated region body
PF: predicated region fallthrough
CT: control target
= control target key end

     0   :  { %8 = vsyncpa [#allocation3], 0  ;;  %s2017_s0 = inlined_call_operand.hbm [shape: f32[2,18,8,256], index: 0, kind: input, shape index: {}]   ;;  %s2018_s1 = inlined_call_operand.vmem [shape: f32[8,72], index: 1, kind: input, shape index: {}]   ;;  %s2019_s2 = inlined_call_operand.vmem [shape: f32[8,1], index: 2, kind: input, shape index: {}]   ;;  %s2020_s3 = inlined_call_operand.hbm [shape: f32[2,16,8,128], index: 3, kind: output, shape index: {}]  }
   0x1   :  { %10 = vsyncpa [#allocation3 + $0x1], 0 }
   0x2   :  { %11 = vsyncpa [#allocation4], 0 }
   0x3   :  { %13 = vsyncpa [#allocation4 + $0x1], 0  ;;  %s1601_s12 = smov 0   ;;  %s1603_s13 = smov 0  }
   0x4   :  { %s1605_s14 = smov 0   ;;  %s1607_s15 = smov 0  }
   0x5   :  { %s1609_s16 = smov 0   ;;  %s1611_s17 = smov 0  }
   0x6   :  { %s1613_s18 = smov 0   ;;  %s1615_s19 = smov 0  }
   0x7   :  { %s1617_s20 = smov 0   ;;  %s1619_s21 = smov 0  }
   0x8   :  { %s1621_s22 = smov 0  }
   0x9 LB: > { %2025 = sst [smem:[#allocation8_spill]] %s1564_s20  ;;  %s961_s23 = sadd.s32 4294967295, %s1572_s22   ;;  %s1572_s22 = sphi %s1621_s22, %s19_s22   ;;  %s1568_s21 = sphi %s1619_s21, %s2038_s21   ;;  %s1564_s20 = sphi %s1617_s20, %s2037_s20   ;;  %s1560_s19 = sphi %s1615_s19, %s2036_s19   ;;  %s1556_s18 = sphi %s1613_s18, %s2035_s18   ;;  %s1552_s17 = sphi %s1611_s17, %s2044_s17   ;;  %s1548_s16 = sphi %s1609_s16, %s2043_s16   ;;  %s1544_s15 = sphi %s1607_s15, %s2042_s15   ;;  %s1540_s14 = sphi %s1605_s14, %s2041_s14   ;;  %s1536_s13 = sphi %s1603_s13, %s2040_s13   ;;  %s1532_s12 = sphi %s1601_s12, %s2039_s12  }
   0xa   : > { %2026 = sst [smem:[#allocation9_spill]] %s1568_s21  ;;  %s962_s24 = sadd.s32 4294967294, %s1572_s22  }
   0xb   : > { %s28_s25 = sadd.s32 1, %s1564_s20  ;;  %s31_s26 = sadd.s32 1, %s1568_s21 }
   0xc   : > { %p29_p0 = scmp.ge.s32.totalorder %s28_s25, 2  ;;  %s38_s27 = sadd.s32 1, %s1552_s17 }
   0xd   : > { %p45_p1 = scmp.ne.s32.totalorder %s1552_s17, %s1548_s16  ;;  %p46_p2 = scmp.eq.s32.totalorder %s1572_s22, 0 }
   0xe   : > { %s2046_s25 = smov (%p29_p0, %s28_s25), 0  ;;  %s2048_s26 = smov (!%p29_p0, %s31_s26), %s1568_s21 }
   0xf   : > { %2027 = sst [smem:[#allocation10_spill]] %s2046_s25  ;;  %p1665_p3 = por %p46_p2, %p45_p1 }
  0x10   : > { %p51_p4 = scmp.ne.s32.totalorder %s1548_s16, %s1544_s15  ;;  %p33_p5 = scmp.ge.s32.totalorder %s2048_s26, 2 }
  0x11   : > { %p52_p6 = scmp.eq.s32.totalorder %s961_s23, 0  ;;  %s104_s29 = ssub.s32 %s1564_s20, %s2046_s25 }
  0x12   : > { %s108_s30 = sadd.s32 1, %s1540_s14  ;;  %s2050_s26 = smov (%p33_p5, %s2048_s26), 0 }
  0x13   : > { %2029 = sst [smem:[#allocation11_spill]] %s2050_s26  ;;  %p1675_p7 = por %p52_p6, %p51_p4 }
  0x14   : > { %p118_p8 = scmp.ne.s32.totalorder %s1540_s14, %s1536_s13  ;;  %s35_s5 = ssub.s32 %s1568_s21, %s2050_s26 }
  0x15   : > { %p119_p9 = scmp.eq.s32.totalorder %s961_s23, 3  ;;  %p36_p10 = scmp.eq.s32.totalorder %s35_s5, 0 }
  0x16   : > { %s105_s6 = sor.u32 %s104_s29, %s35_s5  ;;  %p124_p13 = scmp.ne.s32.totalorder %s1536_s13, %s1532_s12 }
  0x17   : > { %p106_p11 = scmp.eq.s32.totalorder %s105_s6, 0  ;;  %p1683_p12 = por %p119_p9, %p118_p8 }
  0x18   : > { %s1688_s8 = scalar_select %p36_p10, %s1552_s17, %s38_s27  }
  0x19   : > { %s1691_s9 = scalar_select %p106_p11, %s1540_s14, %s108_s30  }
  0x1a   : > { %2032 = sst [smem:[#allocation12_spill]] %s1688_s8  ;;  %p125_p0 = scmp.eq.s32.totalorder %s962_s24, 3 }
  0x1b   : > { %p1082_p1 = scmp.lt.s32.totalorder %s1572_s22, 4  ;;  %s151_s11 = sand.u32 1, %s1552_s17  }
  0x1c   : > { %p1696_p2 = por %p125_p0, %p124_p13  ;;  %s1067_s15 = smul.u32 288, %s151_s11 }
  0x1d   : > { %s1068_s23 = smul.u32 288, %s1568_s21  ;;  %p1075_p4 = pnand %p1082_p1, %p1665_p3 }
  0x1e   : > { %s155_s6 = scalar_lea.vmem [#allocation2], %s1067_s15  ;;  %p966_p5 = scmp.ge.s32.totalorder %s1572_s22, 1 }
  0x1f   : > { %s160_s27 = scalar_lea.hbm %s2017_s0, %s1068_s23  ;;  %s163_s30 = sshll.u32 %s155_s6, 4  ;;  %s164_s30 = int_to_ptr.vmem [resolvable:$true] %s163_s30 }
  0x20   : > { %s161_s26 = sshll.u32 %s160_s27, 4  ;;  %s152_s24 = scalar_lea.sflag [#allocation3], %s151_s11  ;;  %s162_s26 = int_to_ptr.hbm [resolvable:$true] %s161_s26 }
  0x21   : > { %s1574_s25 = smov 256   ;;  %s1575_s20 = smov 16  }
  0x22   : > { %1077 = dma.hbm_to_vmem [thread:$0]  (!%p1075_p4), %s162_s26, 4608, %s164_s30, %s152_s24, %s1574_s25, %s1574_s25, %s1575_s20  }
  0x23   : > { %p171_p6 = scmp.lt.s32.totalorder %s1572_s22, 5 }
  0x25   : > { %p172_p8 = pnand %p966_p5, %p171_p6 }
  0x26   : > { %s177_s28 = sand.u32 (!%p172_p8), 1, %s1548_s16  }
  0x27   : > { %175 = sbr.rel (%p172_p8) target bundleno = 431 (0x1af), region = 32  ;;  %s178_s8 = scalar_lea.sflag (!%p172_p8), [#allocation3], %s177_s28 }
  0x28   : > { %s1069_s21 = smul.u32 (!%p172_p8), 288, %s177_s28 }
  0x2a   : > { %s181_s29 = scalar_lea.vmem (!%p172_p8), [#allocation2], %s1069_s21 }
  0x2c   : > { %1523 = dma.done.wait (%p1675_p7), %s178_s8, 4608  }
  0x2d   : > { %1525 = vsyncadd (%p1675_p7), %s178_s8, 4294962688  ;;  %s1057_s15 = sshll.u32 %s1556_s18, 7  ;;  %v1576_v0 = vmov 0   ;;  %s1577_s20 = smov 127   ;;  %v207_v10 = vld [vmem:[%s2019_s2] sm:$0xff]  ;;  %vm239_vm0 = vcmask 1031168  }
  0x2e   : > { %1209 = vset.pattern.permute.xlu0 %v1576_v0  ;;  %s1715_s11 = scalar_lea.vmem %s181_s29, %s1057_s15 [#allocation2]  ;;  %s1578_s21 = smov 126   ;;  %vm232_vm1 = vcmask 1039360   ;;  %v1843_v0 = vld [vmem:[%s2018_s1] sm:$0xff]  ;;  %vm275_vm2 = vcmask 588800  }
  0x2f   : > { %v1718_v1 = vld [vmem:[%s1715_s11 + $0x10] sm:$0xff]  ;;  %v974_v2 = vld [vmem:[%s1715_s11 + $0x18] sm:$0xff]  ;;  %v1722_v3 = vld [vmem:[%s1715_s11] sm:$0xff]  ;;  %s202_s23 = sand.u32 1, %s1536_s13   ;;  %s1051_s6 = sshll.u32 %s1556_s18, 3 }
  0x30   : > { %v1194_v4 = vpack.i.bf16 %v974_v2, %v1718_v1  ;;  %v213_v5 = vld [vmem:[%s1715_s11 + $0x8] sm:$0xff]  ;;  %v1727_v6 = vld [vmem:[%s1715_s11 + $0x20] sm:$0xff]  ;;  %v1743_v11 = vld [vmem:[%s1715_s11 + $0x30] sm:$0xff]  ;;  %s967_s5 = sshll.u32 %s202_s23, 6  ;;  %s1052_s30 = sshll.u32 %s1560_s19, 4 }
  0x31   : > { %v1179_v7 = vpack.i.bf16 %v213_v5, %v1722_v3  ;;  %v978_v8 = vld [vmem:[%s1715_s11 + $0x28] sm:$0xff]  ;;  %v987_v12 = vld [vmem:[%s1715_s11 + $0x38] sm:$0xff]  ;;  %v1754_v14 = vld [vmem:[%s1715_s11 + $0x50] sm:$0xff]  ;;  %s1945_s27 = scalar_lea.vmem [#allocation5], %s967_s5  ;;  %s830_s24 = sadd.s32 %s1052_s30, %s1051_s6 }
  0x32   : > { %1190 = vrot.lane.b32.xlu1 %v1194_v4, %s1577_s20  ;;  %v1204_v9 = vpack.i.bf16 %v978_v8, %v1727_v6  ;;  %v1230_v13 = vpack.i.bf16 %v987_v12, %v1743_v11  ;;  %v1007_v15 = vld [vmem:[%s1715_s11 + $0x58] sm:$0xff]  ;;  %v1762_v17 = vld [vmem:[%s1715_s11 + $0x40] sm:$0xff]  ;;  %v997_v18 = vld [vmem:[%s1715_s11 + $0x48] sm:$0xff]  ;;  %s1053_s28 = sshll.u32 %s830_s24, 3  ;;  %s819_s19 = scalar_lea.sflag [#allocation4], %s202_s23 }
  0x33   : > { %1180 = vrot.lane.b32.xlu0 %v1179_v7, %s1577_s20  ;;  %v1759_v16 = vpack.i.bf16 %v1007_v15, %v1754_v14  ;;  %v1265_v19 = vpack.i.bf16 %v997_v18, %v1762_v17  ;;  %v1773_v20 = vld [vmem:[%s1715_s11 + $0x80] sm:$0xff]  ;;  %v1037_v21 = vld [vmem:[%s1715_s11 + $0x88] sm:$0xff]  ;;  %v1782_v23 = vld [vmem:[%s1715_s11 + $0x90] sm:$0xff]  ;;  %s1470_s8 = scalar_lea.hbm %s2020_s3, 256 }
  0x34   : > { %1200 = vrot.lane.b32.xlu2 %v1204_v9, %s1577_s20  ;;  %v1290_v22 = vpack.i.bf16 %v1037_v21, %v1773_v20  ;;  %v1047_v24 = vld [vmem:[%s1715_s11 + $0x98] sm:$0xff]  ;;  %v1790_v26 = vld [vmem:[%s1715_s11 + $0x60] sm:$0xff]  ;;  %v1017_v27 = vld [vmem:[%s1715_s11 + $0x68] sm:$0xff] }
  0x35   : > { %v1295_v25 = vpack.i.bf16 %v1047_v24, %v1782_v23  ;;  %v1320_v28 = vpack.i.bf16 %v1017_v27, %v1790_v26  ;;  %v1798_v29 = vld [vmem:[%s1715_s11 + $0x70] sm:$0xff]  ;;  %v1027_v30 = vld [vmem:[%s1715_s11 + $0x78] sm:$0xff]  ;;  %s832_s11 = scalar_lea.hbm %s2020_s3, %s1053_s28 }
  0x36   : > { %v1325_v31 = vpack.i.bf16 %v1027_v30, %v1798_v29  ;;  %s835_s18 = sshll.u32 %s832_s11, 4  ;;  %s836_s18 = int_to_ptr.hbm [resolvable:$true] %s835_s18 }
  0x3a   : > { %1195 = vrot.lane.b32.xlu1 %v1194_v4, %s1578_s21 }
  0x3b   : > { %1185 = vrot.lane.b32.xlu0 %v1179_v7, %s1578_s21 }
  0x3c   : > { %1205 = vrot.lane.b32.xlu2 %v1204_v9, %s1578_s21 }
  0x42   : > { %1211 = vrot.lane.b32.xlu1 %v1194_v4, %s1577_s20 }
  0x43   : > { %272 = vperm.xlu0 %1209, %v207_v10  }
  0x44   : > { %1216 = vrot.lane.b32.xlu2 %v1194_v4, %s1578_s21 }
  0x4a   : > { %1221 = vrot.lane.b32.xlu1 %v1204_v9, %s1577_s20 }
  0x4b   : > { %1231 = vrot.lane.b32.xlu0 %v1230_v13, %s1577_s20 }
  0x4c   : > { %1226 = vrot.lane.b32.xlu2 %v1204_v9, %s1578_s21 }
  0x52   : > { %1236 = vrot.lane.b32.xlu1 %v1230_v13, %s1578_s21 }
  0x53   : > { %1246 = vrot.lane.b32.xlu0 %v1204_v9, %s1578_s21 }
  0x54   : > { %1241 = vrot.lane.b32.xlu2 %v1204_v9, %s1577_s20 }
  0x5a   : > { %1251 = vrot.lane.b32.xlu1 %v1230_v13, %s1577_s20 }
  0x5b   : > { %1261 = vrot.lane.b32.xlu0 %v1759_v16, %s1578_s21 }
  0x5c   : > { %1256 = vrot.lane.b32.xlu2 %v1265_v19, %s1578_s21 }
  0x62   : > { %1266 = vrot.lane.b32.xlu1 %v1265_v19, %s1577_s20 }
  0x63   : > { %1276 = vrot.lane.b32.xlu0 %v1230_v13, %s1578_s21 }
  0x64   : > { %1271 = vrot.lane.b32.xlu2 %v1759_v16, %s1577_s20 }
  0x6a   : > { %1281 = vrot.lane.b32.xlu1 %v1265_v19, %s1578_s21 }
  0x6b   : > { %1291 = vrot.lane.b32.xlu0 %v1290_v22, %s1578_s21 }
  0x6c   : > { %1286 = vrot.lane.b32.xlu2 %v1265_v19, %s1577_s20 }
  0x72   : > { %1296 = vrot.lane.b32.xlu1 %v1295_v25, %s1578_s21 }
  0x73   : > { %1306 = vrot.lane.b32.xlu0 %v1295_v25, %s1577_s20 }
  0x74   : > { %1301 = vrot.lane.b32.xlu2 %v1290_v22, %s1577_s20 }
  0x7a   : > { %1311 = vrot.lane.b32.xlu1 %v1230_v13, %s1578_s21 }
  0x7b   : > { %1321 = vrot.lane.b32.xlu0 %v1320_v28, %s1578_s21 }
  0x7c   : > { %1316 = vrot.lane.b32.xlu2 %v1230_v13, %s1577_s20 }
  0x82   : > { %1326 = vrot.lane.b32.xlu1 %v1325_v31, %s1578_s21 }
  0x83   : > { %1336 = vrot.lane.b32.xlu0 %v1290_v22, %s1578_s21 }
  0x84   : > { %1331 = vrot.lane.b32.xlu2 %v1325_v31, %s1578_s21 }
  0x8a   : > { %1341 = vrot.lane.b32.xlu1 %v1320_v28, %s1577_s20 }
  0x8b   : > { %1351 = vrot.lane.b32.xlu0 %v1325_v31, %s1577_s20 }
  0x8c   : > { %1346 = vrot.lane.b32.xlu2 %v1325_v31, %s1577_s20 }
  0x8e   : > { %v1201_v32 = vpop.permute.xlu2 %1200 }
  0x8f   : > { %v1203_v33 = vunpack.i.h.bf16 %v1201_v32  ;;  %v1202_v34 = vunpack.i.l.bf16 %v1201_v32 }
  0x91   : > { %v262_v39 = vsel %vm232_vm1, %v1202_v34, %v1203_v33 }
  0x92   : > { %1356 = vrot.lane.b32.xlu1 %v1290_v22, %s1577_s20 }
  0x93   : > { %1366 = vrot.lane.b32.xlu0 %v1320_v28, %s1578_s21 }
  0x94   : > { %1361 = vrot.lane.b32.xlu2 %v1759_v16, %s1578_s21 }
  0x96   : > { %v1206_v35 = vpop.permute.xlu2 %1205 }
  0x97   : > { %v1208_v36 = vunpack.i.h.bf16 %v1206_v35  ;;  %v1207_v37 = vunpack.i.l.bf16 %v1206_v35 }
  0x99   : > { %v268_v38 = vsel %vm239_vm0, %v1207_v37, %v1208_v36 }
  0x9a   : > { %1371 = vrot.lane.b32.xlu1 %v1320_v28, %s1578_s21  ;;  %286 = vmatpush.msra.mxu0 %v268_v38 }
  0x9b   : > { %1381 = vrot.lane.b32.xlu0 %v1759_v16, %s1577_s20 }
  0x9c   : > { %1376 = vrot.lane.b32.xlu2 %v1325_v31, %s1578_s21  ;;  %287 = vmatpush.msra.mxu0 %v262_v39 }
  0x9e   : > { %v1819_v40 = vpop.permute.xlu2 %1216  ;;  %288 = vmatpush.msra.mxu0 %v1727_v6 }
  0x9f   : > { %v1219_v35 = vunpack.i.h.bf16 %v1819_v40  ;;  %v1218_v36 = vunpack.i.l.bf16 %v1819_v40 }
  0xa2   : > { %1386 = vrot.lane.b32.xlu1 %v1320_v28, %s1577_s20 }
  0xa3   : > { %1396 = vrot.lane.b32.xlu0 %v1325_v31, %s1577_s20 }
  0xa4   : > { %v1191_v41 = vpop.permute.xlu1 %1190  ;;  %1391 = vrot.lane.b32.xlu2 %v1320_v28, %s1577_s20 }
  0xa5   : > { %v1181_v42 = vpop.permute.xlu0 %1180  ;;  %v1193_v45 = vunpack.i.h.bf16 %v1191_v41  ;;  %v1192_v46 = vunpack.i.l.bf16 %v1191_v41 }
  0xa6   : > { %v1227_v43 = vpop.permute.xlu2 %1226  ;;  %v1183_v55 = vunpack.i.h.bf16 %v1181_v42  ;;  %v1182_v56 = vunpack.i.l.bf16 %v1181_v42 }
  0xa7   : > { %v248_v54 = vsel %vm232_vm1, %v1192_v46, %v1193_v45 }
  0xa8   : > { %v233_v61 = vsel %vm232_vm1, %v1182_v56, %v1183_v55 }
  0xaa   : > { %1401 = vrot.lane.b32.xlu1 %v1265_v19, %s1578_s21 }
  0xab   : > { %1411 = vrot.lane.b32.xlu0 %v1265_v19, %s1577_s20  ;;  %v1228_v19 = vunpack.i.l.bf16 %v1227_v43 }
  0xac   : > { %v1196_v44 = vpop.permute.xlu1 %1195  ;;  %1406 = vrot.lane.b32.xlu2 %v1759_v16, %s1578_s21  ;;  %s1464_s21 = sshra.s32 %s836_s18, 4  ;;  %s1465_s21 = int_to_ptr.hbm [resolvable:$true] %s1464_s21 }
  0xad   : > { %v1198_v47 = vunpack.i.h.bf16 %v1196_v44  ;;  %v1197_v48 = vunpack.i.l.bf16 %v1196_v44  ;;  %v1186_v49 = vpop.permute.xlu0 %1185  ;;  %s1466_s25 = scalar_lea.hbm %s1465_s21, 64  ;;  %p1471_p10 = scmp.lt.s32.totalorder %s1465_s21, %s2020_s3 }
  0xae   : > { %v1829_v50 = vpop.permute.xlu2 %1241  ;;  %v1188_v51 = vunpack.i.h.bf16 %v1186_v49  ;;  %v1187_v52 = vunpack.i.l.bf16 %v1186_v49  ;;  %p1467_p3 = scmp.ne.s32.totalorder %s1465_s21, %s1466_s25  ;;  %p1472_p11 = scmp.lt.s32.totalorder %s1470_s8, %s1466_s25 }
  0xaf   : > { %v254_v53 = vsel %vm239_vm0, %v1197_v48, %v1198_v47 }
  0xb0   : > { %289 = vmatpush.msra.mxu0 %v254_v53  ;;  %v240_v57 = vsel %vm239_vm0, %v1187_v52, %v1188_v51  ;;  %p1468_p7 = pnand %p1467_p3, %p1683_p12  ;;  %p1473_p13 = por %p1472_p11, %p1471_p10 }
  0xb2   : > { %1416 = vrot.lane.b32.xlu1 %v1759_v16, %s1577_s20  ;;  %290 = vmatpush.msra.mxu0 %v248_v54  ;;  %s833_s20 = sshll.u32 %s1945_s27, 4  ;;  %p1469_p9 = pneg %p1468_p7  ;;  %s834_s20 = int_to_ptr.vmem [resolvable:$true] %s833_s20 }
  0xb4   : > { %v1212_v58 = vpop.permute.xlu1 %1211  ;;  %291 = vmatpush.msra.mxu0 %v1718_v1  ;;  %p1474_p0 = pnand %p1473_p13, %p1469_p9 }
  0xb5   : > { %v1837_v59 = vpop.permute.xlu0 %272  ;;  %v1214_v41 = vunpack.i.h.bf16 %v1212_v58  ;;  %v1213_v42 = vunpack.i.l.bf16 %v1212_v58 }
  0xb6   : > { %292 = vmatpush.msra.mxu0 %v240_v57  ;;  %v1257_v60 = vpop.permute.xlu2 %1256 }
  0xb7   : > { %v1259_v62 = vunpack.i.h.bf16 %v1257_v60  ;;  %v1258_v63 = vunpack.i.l.bf16 %v1257_v60  ;;  %v316_v47 = vsel %vm232_vm1, %v1213_v42, %v1214_v41 }
  0xb8   : > { %293 = vmatpush.msra.mxu0 %v233_v61 }
  0xb9   : > { %v424_v2 = vsel %vm239_vm0, %v1258_v63, %v1259_v62 }
  0xba   : > { %294 = vmatpush.msra.mxu0 %v1722_v3  ;;  %433 = vmatpush.msra.mxu2 %v424_v2  ;;  %v1229_v3 = vunpack.i.h.bf16 %v1227_v43  ;;  %v322_v43 = vsel %vm239_vm0, %v1218_v36, %v1219_v35 }
  0xbb   : > { %979 = vmatmul.msk.f32.vlgmr.msra.gmra.mxu0 %vm275_vm2, %v1843_v0 }
  0xbc   : > { %v1222_v4 = vpop.permute.xlu1 %1221  ;;  %v336_v31 = vsel %vm239_vm0, %v1228_v19, %v1229_v3 }
  0xbd   : > { %v1232_v5 = vpop.permute.xlu0 %1231  ;;  %v1224_v22 = vunpack.i.h.bf16 %v1222_v4  ;;  %v1223_v24 = vunpack.i.l.bf16 %v1222_v4  ;;  %v1244_v4 = vunpack.i.h.bf16 %v1829_v50 }
  0xbe   : > { %v1272_v7 = vpop.permute.xlu2 %1271  ;;  %v1234_v9 = vunpack.i.h.bf16 %v1232_v5  ;;  %v1233_v10 = vunpack.i.l.bf16 %v1232_v5  ;;  %v1243_v5 = vunpack.i.l.bf16 %v1829_v50 }
  0xbf   : > { %v1274_v27 = vunpack.i.h.bf16 %v1272_v7  ;;  %v1273_v28 = vunpack.i.l.bf16 %v1272_v7  ;;  %v330_v37 = vsel %vm232_vm1, %v1223_v24, %v1224_v22 }
  0xc0   : > { %v344_v21 = vsel %vm232_vm1, %v1233_v10, %v1234_v9  ;;  %v390_v50 = vsel %vm232_vm1, %v1243_v5, %v1244_v4 }
  0xc1   : > { %v492_v39 = vsel %vm232_vm1, %v1273_v28, %v1274_v27 }
  0xc4   : > { %v1237_v8 = vpop.permute.xlu1 %1236 }
  0xc5   : > { %v1239_v12 = vunpack.i.h.bf16 %v1237_v8  ;;  %v1238_v13 = vunpack.i.l.bf16 %v1237_v8  ;;  %v1849_v15 = vpop.permute.xlu0 %1246 }
  0xc6   : > { %v1851_v16 = vpop.permute.xlu2 %1286  ;;  %v1249_v58 = vunpack.i.h.bf16 %v1849_v15 }
  0xc7   : > { %v350_v18 = vsel %vm239_vm0, %v1238_v13, %v1239_v12  ;;  %v1289_v56 = vunpack.i.h.bf16 %v1851_v16  ;;  %v1288_v57 = vunpack.i.l.bf16 %v1851_v16 }
  0xc8   : > { %359 = vmatpush.msra.mxu1 %v350_v18 }
  0xc9   : > { %v478_v8 = vsel %vm232_vm1, %v1288_v57, %v1289_v56 }
  0xca   : > { %360 = vmatpush.msra.mxu1 %v344_v21 }
  0xcc   : > { %v1252_v25 = vpop.permute.xlu1 %1251  ;;  %361 = vmatpush.msra.mxu1 %v1743_v11 }
  0xcd   : > { %v1262_v30 = vpop.permute.xlu0 %1261  ;;  %v1254_v53 = vunpack.i.h.bf16 %v1252_v25  ;;  %v1253_v54 = vunpack.i.l.bf16 %v1252_v25 }
  0xce   : > { %v1264_v32 = vunpack.i.h.bf16 %v1262_v30  ;;  %v1263_v33 = vunpack.i.l.bf16 %v1262_v30  ;;  %362 = vmatpush.msra.mxu1 %v336_v31  ;;  %v1857_v34 = vpop.permute.xlu2 %1301 }
  0xcf   : > { %v404_v2 = vsel %vm232_vm1, %v1253_v54, %v1254_v53  ;;  %v1303_v16 = vunpack.i.l.bf16 %v1857_v34 }
  0xd0   : > { %363 = vmatpush.msra.mxu1 %v330_v37  ;;  %v498_v38 = vsel %vm239_vm0, %v1263_v33, %v1264_v32 }
  0xd1   : > { %507 = vmatpush.msra.mxu3 %v498_v38 }
  0xd2   : > { %364 = vmatpush.msra.mxu1 %v1727_v6 }
  0xd3   : > { %508 = vmatpush.msra.mxu3 %v492_v39 }
  0xd4   : > { %v1267_v44 = vpop.permute.xlu1 %1266  ;;  %365 = vmatpush.msra.mxu1 %v322_v43 }
  0xd5   : > { %v1269_v45 = vunpack.i.h.bf16 %v1267_v44  ;;  %v1268_v46 = vunpack.i.l.bf16 %v1267_v44  ;;  %v1277_v40 = vpop.permute.xlu0 %1276  ;;  %509 = vmatpush.msra.mxu3 %v1754_v14 }
  0xd6   : > { %v1279_v48 = vunpack.i.h.bf16 %v1277_v40  ;;  %v1278_v49 = vunpack.i.l.bf16 %v1277_v40  ;;  %366 = vmatpush.msra.mxu1 %v316_v47  ;;  %v1317_v51 = vpop.permute.xlu2 %1316 }
  0xd7   : > { %v418_v52 = vsel %vm232_vm1, %v1268_v46, %v1269_v45  ;;  %v1319_v27 = vunpack.i.h.bf16 %v1317_v51  ;;  %v1318_v28 = vunpack.i.l.bf16 %v1317_v51 }
  0xd8   : > { %367 = vmatpush.msra.mxu1 %v1718_v1  ;;  %434 = vmatpush.msra.mxu2 %v418_v52  ;;  %v410_v55 = vsel %vm239_vm0, %v1278_v49, %v1279_v48  ;;  %v1248_v1 = vunpack.i.l.bf16 %v1849_v15  ;;  %v1304_v15 = vunpack.i.h.bf16 %v1857_v34 }
  0xd9   : > { %988 = vmatmul.msk.f32.vlgmr.msra.gmra.mxu1 %vm275_vm2, %v1843_v0  ;;  %v464_v37 = vsel %vm232_vm1, %v1318_v28, %v1319_v27 }
  0xda   : > { %435 = vmatpush.msra.mxu2 %v1762_v17  ;;  %v396_v13 = vsel %vm239_vm0, %v1248_v1, %v1249_v58  ;;  %v714_v24 = vsel %vm232_vm1, %v1303_v16, %v1304_v15 }
  0xdc   : > { %v1282_v60 = vpop.permute.xlu1 %1281  ;;  %436 = vmatpush.msra.mxu2 %v410_v55 }
  0xdd   : > { %v1284_v61 = vunpack.i.h.bf16 %v1282_v60  ;;  %v1283_v62 = vunpack.i.l.bf16 %v1282_v60  ;;  %v1292_v63 = vpop.permute.xlu0 %1291 }
  0xde   : > { %437 = vmatpush.msra.mxu2 %v404_v2  ;;  %v1332_v9 = vpop.permute.xlu2 %1331  ;;  %v1294_v10 = vunpack.i.h.bf16 %v1292_v63  ;;  %v1293_v12 = vunpack.i.l.bf16 %v1292_v63 }
  0xdf   : > { %v484_v7 = vsel %vm239_vm0, %v1283_v62, %v1284_v61  ;;  %v1334_v21 = vunpack.i.h.bf16 %v1332_v9  ;;  %v1333_v22 = vunpack.i.l.bf16 %v1332_v9 }
  0xe0   : > { %438 = vmatpush.msra.mxu2 %v1743_v11  ;;  %510 = vmatpush.msra.mxu3 %v484_v7  ;;  %v720_v19 = vsel %vm239_vm0, %v1293_v12, %v1294_v10 }
  0xe1   : > { %v706_v30 = vsel %vm239_vm0, %v1333_v22, %v1334_v21 }
  0xe2   : > { %439 = vmatpush.msra.mxu2 %v396_v13  ;;  %511 = vmatpush.msra.mxu3 %v478_v8 }
  0xe4   : > { %v1297_v18 = vpop.permute.xlu1 %1296  ;;  %440 = vmatpush.msra.mxu2 %v390_v50  ;;  %512 = vmatpush.msra.mxu3 %v1762_v17 }
  0xe5   : > { %v1307_v3 = vpop.permute.xlu0 %1306  ;;  %v1299_v39 = vunpack.i.h.bf16 %v1297_v18  ;;  %v1298_v41 = vunpack.i.l.bf16 %v1297_v18 }
  0xe6   : > { %441 = vmatpush.msra.mxu2 %v1727_v6  ;;  %v1347_v25 = vpop.permute.xlu2 %1346  ;;  %v1309_v42 = vunpack.i.h.bf16 %v1307_v3  ;;  %v1308_v43 = vunpack.i.l.bf16 %v1307_v3 }
  0xe7   : > { %998 = vmatmul.msk.f32.vlgmr.msra.gmra.mxu2 %vm275_vm2, %v1843_v0  ;;  %v1349_v44 = vunpack.i.h.bf16 %v1347_v25  ;;  %v1348_v45 = vunpack.i.l.bf16 %v1347_v25  ;;  %v794_v51 = vsel %vm239_vm0, %v1298_v41, %v1299_v39 }
  0xe8   : > { %729 = vmatpush.msrb.mxu2 %v720_v19  ;;  %v788_v54 = vsel %vm232_vm1, %v1308_v43, %v1309_v42 }
  0xe9   : > { %v640_v56 = vsel %vm232_vm1, %v1348_v45, %v1349_v44 }
  0xea   : > { %730 = vmatpush.msrb.mxu2 %v714_v24 }
  0xec   : > { %v1312_v31 = vpop.permute.xlu1 %1311  ;;  %731 = vmatpush.msrb.mxu2 %v1773_v20 }
  0xed   : > { %v1314_v32 = vunpack.i.h.bf16 %v1312_v31  ;;  %v1313_v33 = vunpack.i.l.bf16 %v1312_v31  ;;  %v1322_v6 = vpop.permute.xlu0 %1321 }
  0xee   : > { %v1324_v34 = vunpack.i.h.bf16 %v1322_v6  ;;  %v1323_v35 = vunpack.i.l.bf16 %v1322_v6  ;;  %732 = vmatpush.msrb.mxu2 %v706_v30  ;;  %v1362_v40 = vpop.permute.xlu2 %1361 }
  0xef   : > { %v470_v36 = vsel %vm239_vm0, %v1313_v33, %v1314_v32  ;;  %v1364_v61 = vunpack.i.h.bf16 %v1362_v40  ;;  %v1363_v62 = vunpack.i.l.bf16 %v1362_v40 }
  0xf0   : > { %513 = vmatpush.msra.mxu3 %v470_v36  ;;  %v572_v38 = vsel %vm239_vm0, %v1323_v35, %v1324_v34 }
  0xf1   : > { %581 = vmatpush.msrb.mxu0 %v572_v38 }
  0xf2   : > { %514 = vmatpush.msra.mxu3 %v464_v37 }
  0xf4   : > { %v1327_v46 = vpop.permute.xlu1 %1326  ;;  %515 = vmatpush.msra.mxu3 %v1743_v11 }
  0xf5   : > { %v1329_v47 = vunpack.i.h.bf16 %v1327_v46  ;;  %v1328_v48 = vunpack.i.l.bf16 %v1327_v46  ;;  %v1337_v49 = vpop.permute.xlu0 %1336  ;;  %1008 = vmatmul.msk.f32.vlgmr.msra.gmra.mxu3 %vm275_vm2, %v1843_v0 }
  0xf6   : > { %v1339_v52 = vunpack.i.h.bf16 %v1337_v49  ;;  %v1338_v53 = vunpack.i.l.bf16 %v1337_v49  ;;  %803 = vmatpush.msrb.mxu3 %v794_v51  ;;  %v1377_v4 = vpop.permute.xlu2 %1376 }
  0xf7   : > { %v646_v55 = vsel %vm239_vm0, %v1328_v48, %v1329_v47  ;;  %v1379_v13 = vunpack.i.h.bf16 %v1377_v4  ;;  %v1378_v15 = vunpack.i.l.bf16 %v1377_v4 }
  0xf8   : > { %804 = vmatpush.msrb.mxu3 %v788_v54  ;;  %655 = vmatpush.msrb.mxu1 %v646_v55  ;;  %v780_v11 = vsel %vm239_vm0, %v1338_v53, %v1339_v52 }
  0xf9   : > { %v766_v21 = vsel %vm239_vm0, %v1378_v15, %v1379_v13 }
  0xfa   : > { %805 = vmatpush.msrb.mxu3 %v1782_v23  ;;  %656 = vmatpush.msrb.mxu1 %v640_v56  ;;  %v558_v23 = vsel %vm239_vm0, %v1363_v62, %v1364_v61 }
  0xfc   : > { %v1342_v57 = vpop.permute.xlu1 %1341  ;;  %806 = vmatpush.msrb.mxu3 %v780_v11  ;;  %657 = vmatpush.msrb.mxu1 %v1798_v29 }
  0xfd   : > { %v1344_v58 = vunpack.i.h.bf16 %v1342_v57  ;;  %v1343_v60 = vunpack.i.l.bf16 %v1342_v57  ;;  %v1352_v1 = vpop.permute.xlu0 %1351 }
  0xfe   : > { %v1354_v63 = vunpack.i.h.bf16 %v1352_v1  ;;  %v1353_v2 = vunpack.i.l.bf16 %v1352_v1  ;;  %v1392_v3 = vpop.permute.xlu2 %1391 }
  0xff   : > { %v566_v5 = vsel %vm232_vm1, %v1343_v60, %v1344_v58  ;;  %v1394_v22 = vunpack.i.h.bf16 %v1392_v3  ;;  %v1393_v24 = vunpack.i.l.bf16 %v1392_v3 }
 0x100   : > { %582 = vmatpush.msrb.mxu0 %v566_v5  ;;  %v700_v7 = vsel %vm232_vm1, %v1353_v2, %v1354_v63 }
 0x101   : > { %733 = vmatpush.msrb.mxu2 %v700_v7  ;;  %v686_v6 = vsel %vm232_vm1, %v1393_v24, %v1394_v22 }
 0x102   : > { %583 = vmatpush.msrb.mxu0 %v1790_v26 }
 0x103   : > { %734 = vmatpush.msrb.mxu2 %v1798_v29 }
 0x104   : > { %v1357_v8 = vpop.permute.xlu1 %1356  ;;  %584 = vmatpush.msrb.mxu0 %v558_v23 }
 0x105   : > { %v1359_v9 = vunpack.i.h.bf16 %v1357_v8  ;;  %v1358_v10 = vunpack.i.l.bf16 %v1357_v8  ;;  %v1367_v12 = vpop.permute.xlu0 %1366 }
 0x106   : > { %v1369_v16 = vunpack.i.h.bf16 %v1367_v12  ;;  %v1368_v50 = vunpack.i.l.bf16 %v1367_v12  ;;  %v1407_v35 = vpop.permute.xlu2 %1406 }
 0x107   : > { %v774_v18 = vsel %vm232_vm1, %v1358_v10, %v1359_v9  ;;  %v1409_v39 = vunpack.i.h.bf16 %v1407_v35  ;;  %v1408_v41 = vunpack.i.l.bf16 %v1407_v35 }
 0x108   : > { %807 = vmatpush.msrb.mxu3 %v774_v18  ;;  %v632_v19 = vsel %vm239_vm0, %v1368_v50, %v1369_v16 }
 0x109   : > { %658 = vmatpush.msrb.mxu1 %v632_v19  ;;  %v618_v46 = vsel %vm239_vm0, %v1408_v41, %v1409_v39 }
 0x10a   : > { %808 = vmatpush.msrb.mxu3 %v1773_v20 }
 0x10c   : > { %v1372_v25 = vpop.permute.xlu1 %1371  ;;  %809 = vmatpush.msrb.mxu3 %v766_v21 }
 0x10d   : > { %v1374_v27 = vunpack.i.h.bf16 %v1372_v25  ;;  %v1373_v28 = vunpack.i.l.bf16 %v1372_v25  ;;  %v1382_v30 = vpop.permute.xlu0 %1381 }
 0x10e   : > { %v1384_v31 = vunpack.i.h.bf16 %v1382_v30  ;;  %v1383_v32 = vunpack.i.l.bf16 %v1382_v30 }
 0x10f   : > { %v692_v33 = vsel %vm239_vm0, %v1373_v28, %v1374_v27 }
 0x110   : > { %735 = vmatpush.msrb.mxu2 %v692_v33  ;;  %v552_v34 = vsel %vm232_vm1, %v1383_v32, %v1384_v31 }
 0x111   : > { %585 = vmatpush.msrb.mxu0 %v552_v34 }
 0x112   : > { %736 = vmatpush.msrb.mxu2 %v686_v6 }
 0x113   : > { %586 = vmatpush.msrb.mxu0 %v1754_v14 }
 0x114   : > { %v1387_v20 = vpop.permute.xlu1 %1386  ;;  %737 = vmatpush.msrb.mxu2 %v1790_v26 }
 0x115   : > { %v1389_v36 = vunpack.i.h.bf16 %v1387_v20  ;;  %v1388_v37 = vunpack.i.l.bf16 %v1387_v20  ;;  %v1397_v38 = vpop.permute.xlu0 %1396  ;;  %1038 = vmatmul.msk.f32.vlgmr.msrb.gmra.mxu2 %vm275_vm2, %v1843_v0 }
 0x116   : > { %v1399_v42 = vunpack.i.h.bf16 %v1397_v38  ;;  %v1398_v43 = vunpack.i.l.bf16 %v1397_v38 }
 0x117   : > { %v626_v44 = vsel %vm232_vm1, %v1388_v37, %v1389_v36 }
 0x118   : > { %659 = vmatpush.msrb.mxu1 %v626_v44  ;;  %v760_v45 = vsel %vm232_vm1, %v1398_v43, %v1399_v42 }
 0x119   : > { %810 = vmatpush.msrb.mxu3 %v760_v45 }
 0x11a   : > { %660 = vmatpush.msrb.mxu1 %v1790_v26 }
 0x11b   : > { %811 = vmatpush.msrb.mxu3 %v1798_v29 }
 0x11c   : > { %1048 = vmatmul.msk.f32.vlgmr.msrb.gmra.mxu3 %vm275_vm2, %v1843_v0  ;;  %v1402_v40 = vpop.permute.xlu1 %1401  ;;  %661 = vmatpush.msrb.mxu1 %v618_v46 }
 0x11d   : > { %v1404_v47 = vunpack.i.h.bf16 %v1402_v40  ;;  %v1403_v48 = vunpack.i.l.bf16 %v1402_v40  ;;  %v1412_v49 = vpop.permute.xlu0 %1411 }
 0x11e   : > { %v1414_v51 = vunpack.i.h.bf16 %v1412_v49  ;;  %v1413_v52 = vunpack.i.l.bf16 %v1412_v49 }
 0x11f   : > { %v544_v53 = vsel %vm239_vm0, %v1403_v48, %v1404_v47 }
 0x120   : > { %587 = vmatpush.msrb.mxu0 %v544_v53  ;;  %v538_v54 = vsel %vm232_vm1, %v1413_v52, %v1414_v51 }
 0x122   : > { %588 = vmatpush.msrb.mxu0 %v538_v54 }
 0x124   : > { %v1417_v26 = vpop.permute.xlu1 %1416  ;;  %589 = vmatpush.msrb.mxu0 %v1762_v17 }
 0x125   : > { %v1419_v29 = vunpack.i.h.bf16 %v1417_v26  ;;  %v1418_v55 = vunpack.i.l.bf16 %v1417_v26  ;;  %1018 = vmatmul.msk.f32.vlgmr.msrb.gmra.mxu0 %vm275_vm2, %v1843_v0 }
 0x127   : > { %v612_v56 = vsel %vm232_vm1, %v1418_v55, %v1419_v29 }
 0x128   : > { %662 = vmatpush.msrb.mxu1 %v612_v56 }
 0x12a   : > { %663 = vmatpush.msrb.mxu1 %v1754_v14 }
 0x12b   : > { %1028 = vmatmul.msk.f32.vlgmr.msrb.gmra.mxu1 %vm275_vm2, %v1843_v0 }
 0x138   : > { %v296_v11 = vpop.f32.mrf.mxu0 }
 0x139   : > { %v297_v17 = vadd.f32 %v296_v11, %v1837_v59 }
 0x13b   : > { %299 = vst [vmem:[%s1945_s27] sm:$0xff] %v297_v17 }
 0x156   : > { %v369_v14 = vpop.f32.mrf.mxu1 }
 0x157   : > { %v370_v57 = vadd.f32 %v369_v14, %v1837_v59 }
 0x159   : > { %989 = vst [vmem:[%s1945_s27 + $0x8] sm:$0xff] %v370_v57 }
 0x16a   : > { %v443_v0 = vpop.f32.mrf.mxu2 }
 0x16b   : > { %v444_v58 = vadd.f32 %v443_v0, %v1837_v59 }
 0x16d   : > { %999 = vst [vmem:[%s1945_s27 + $0x10] sm:$0xff] %v444_v58 }
 0x178   : > { %v517_v60 = vpop.f32.mrf.mxu3 }
 0x179   : > { %v518_v1 = vadd.f32 %v517_v60, %v1837_v59 }
 0x17b   : > { %1009 = vst [vmem:[%s1945_s27 + $0x18] sm:$0xff] %v518_v1 }
 0x198   : > { %v739_v61 = vpop.f32.mrf.mxu2 }
 0x199   : > { %v740_v62 = vadd.f32 %v739_v61, %v1837_v59 }
 0x19b   : > { %1039 = vst [vmem:[%s1945_s27 + $0x30] sm:$0xff] %v740_v62 }
 0x19f   : > { %v813_v63 = vpop.f32.mrf.mxu3 }
 0x1a0   : > { %v814_v2 = vadd.f32 %v813_v63, %v1837_v59 }
 0x1a2   : > { %1049 = vst [vmem:[%s1945_s27 + $0x38] sm:$0xff] %v814_v2  ;;  %v591_v4 = vpop.f32.mrf.mxu0 }
 0x1a3   : > { %v592_v5 = vadd.f32 %v591_v4, %v1837_v59 }
 0x1a5   : > { %1019 = vst [vmem:[%s1945_s27 + $0x20] sm:$0xff] %v592_v5 }
 0x1a8   : > { %v665_v7 = vpop.f32.mrf.mxu1 }
 0x1a9   : > { %v666_v23 = vadd.f32 %v665_v7, %v1837_v59 }
 0x1ab   : > { %1029 = vst [vmem:[%s1945_s27 + $0x28] sm:$0xff] %v666_v23 }
 0x1ac   : > { %1477 = shalt.err (!%p1474_p0)
}
 0x1ad   : > { %s1579_s23 = smov 128   ;;  %s1580_s27 = smov 8  }
 0x1ae   : > { %1072 = dma.vmem_to_hbm [thread:$0]  (%p1683_p12), %s834_s20, 1024, %s836_s18, %s819_s19, %s1579_s23, %s1579_s23, %s1580_s27  }
 0x1af PF: > { %p1083_p1 = scmp.ge.s32.totalorder %s1572_s22, 2  ;;  %s850_s30 = sand.u32 1, %s1532_s12  }
 0x1b0   : > { %s851_s24 = scalar_lea.sflag [#allocation4], %s850_s30 }
 0x1b1   : > { %p1079_p4 = pnand %p1083_p1, %p1696_p2 }
 0x1b3   : > { %p1080_p5 = pneg %p1079_p4 }
 0x1b5   : > { %1527 = dma.done.wait (%p1080_p5), %s851_s24, 1024  }
 0x1b6   : > { %1529 = vsyncadd (%p1080_p5), %s851_s24, 4294966272  ;;  %s19_s22 = sadd.s32 1, %s1572_s22   ;;  %s2034_s7 = sld [smem:[#allocation12_spill]] }
 0x1b7   : > { %p16_p6 = scmp.ge.s32.totalorder %s19_s22, 6   ;;  %s2035_s18 = sld [smem:[#allocation8_spill]] }
 0x1b8   : > { %s2036_s19 = sld [smem:[#allocation9_spill]]  ;;  %s2039_s12 = smov %s1536_s13 }
 0x1b9   : > { %s2037_s20 = sld [smem:[#allocation10_spill]]  ;;  %s2040_s13 = smov %s1540_s14 }
 0x1ba   : > { %s2038_s21 = sld [smem:[#allocation11_spill]]  ;;  %s2041_s14 = smov %s1691_s9 }
 0x1bb   : > { %s2042_s15 = smov %s1548_s16  ;;  %s2043_s16 = smov %s1552_s17 }
 0x1bc   : > { %s2044_s17 = smov %s2034_s7  ;;  %18 = sbr.rel (!%p16_p6) target bundleno = 9 (0x9), region = 94 }
 0x1c1   :  { %857 = vsyncpa [#allocation3], 1 }
 0x1c2   :  { %859 = vsyncpa [#allocation3 + $0x1], 1 }
 0x1c3   :  { %860 = vsyncpa [#allocation4], 1 }
 0x1c4   :  { %862 = vsyncpa [#allocation4 + $0x1], 1 }

</bundles_post_ra>
